<compile_context>
chip_gen: v7x
topology: tpu7x:2x2x1
jax: 0.10.0
libtpu: 0.0.40
codegen_flags: <defaults>
</compile_context>

<pallas_src>
import functools
import math

import jax
import jax.numpy as jnp
import numpy as np
from jax.experimental import pallas as pl
from jax.experimental.pallas import tpu as pltpu

_LEAKY_SLOPE = 0.01   # F.leaky_relu default negative_slope


def _vmem_limit_bytes():
    """Generation-aware scoped-VMEM limit (~48 MiB on v7x, ~96 MiB on v5e/v6e)."""
    try:
        cap = pltpu.get_tpu_info().vmem_capacity_bytes
    except Exception:
        cap = 128 * 1024 * 1024
    return int(min(int(cap * 3 // 4), 100 * 1024 * 1024))


# --------------------------- Kernel 1: fused MLP (+ Wg fold) ------------------ #
def _mlp_kernel(x_ref, w1_ref, b1_ref, w2_ref, b2_ref, wg_ref, o_ref, *, precision):
    """tempW = (leaky_relu(x@W1 + b1) @ W2 + b2) @ Wg for one row tile (all f32 acc)."""
    h = jnp.dot(x_ref[...], w1_ref[...],
                preferred_element_type=jnp.float32, precision=precision)
    h = h + b1_ref[...]
    h = jnp.where(h >= 0, h, _LEAKY_SLOPE * h)
    t = jnp.dot(h.astype(w2_ref.dtype), w2_ref[...],
                preferred_element_type=jnp.float32, precision=precision)
    t = t + b2_ref[...]
    # Wg applied here (associativity) keeps this contraction in f32 and removes a
    # matmul + resident weight tile from the GCN kernel.
    tw = jnp.dot(t, wg_ref[...].astype(jnp.float32),
                 preferred_element_type=jnp.float32, precision=precision)
    o_ref[...] = tw.astype(o_ref.dtype)          # one dense full-tile store


def _proj_kernel(x_ref, w_ref, o_ref, *, precision):
    """tempW = features @ Wg (dim_latent-falsy path: module skips the MLP)."""
    o_ref[...] = jnp.dot(x_ref[...], w_ref[...].astype(jnp.float32),
                         preferred_element_type=jnp.float32,
                         precision=precision).astype(o_ref.dtype)


# --------------------------- Kernel 2: GCN aggregation ------------------------ #
def _gcn_kernel(adj_ref, x_ref, scale_ref, o_ref, acc_ref, *,
                precision, block_k, resident_x):
    """h[i-tile] = scale[i-tile] * (A[i-tile, :] @ tempW), K-tiled, f32 accumulator."""
    k = pl.program_id(1)

    @pl.when(k == 0)
    def _():
        acc_ref[...] = jnp.zeros_like(acc_ref)

    if resident_x:
        # tempW is fully VMEM-resident (constant index_map); slice the K chunk here.
        start = pl.multiple_of(k * block_k, block_k)
        x_blk = x_ref[pl.ds(start, block_k), :]
    else:
        x_blk = x_ref[...]

    acc_ref[...] += jnp.dot(adj_ref[...], x_blk,
                            preferred_element_type=jnp.float32, precision=precision)

    @pl.when(k == pl.num_programs(1) - 1)
    def _():
        # scale = 1 for aggr='add', 1/deg for aggr='mean' (folded here, no adj/deg pass).
        o_ref[...] = (acc_ref[...] * scale_ref[...]).astype(o_ref.dtype)


# --------------------------------- Wrapper ------------------------------------ #
def item_gcn_forward(features, edge_index, params, *, aggr="add",
                     mlp_block=512, gcn_block_m=256, gcn_block_k=512,
                     gcn_dtype=jnp.bfloat16, precision=None):
    """Pallas equivalent of item_GCN.forward(edge_index, features) with att='gcn'."""
    N, dim_feat = features.shape
    out_dtype = features.dtype
    vmem_limit = _vmem_limit_bytes()

    pad_to = math.lcm(mlp_block, gcn_block_m, gcn_block_k)
    n_pad = pad_to * pl.cdiv(N, pad_to)          # ragged N -> zero-pad (padding is inert)
    feats_p = jnp.pad(features, ((0, n_pad - N), (0, 0)))

    wg = params["wg"]

    # ---- tempW = MLP_1(leaky_relu(MLP(features))) @ Wg  (Wg folded in) -------- #
    if params.get("w1") is not None:
        w1, b1 = params["w1"], params["b1"]
        w2, b2 = params["w2"], params["b2"]
        hid = w1.shape[1]
        dim_latent = w2.shape[1]
        temp_w = pl.pallas_call(
            functools.partial(_mlp_kernel, precision=precision),
            out_shape=jax.ShapeDtypeStruct((n_pad, dim_latent), gcn_dtype),
            grid=(n_pad // mlp_block,),
            in_specs=[
                pl.BlockSpec((mlp_block, dim_feat), lambda i: (i, 0)),
                pl.BlockSpec((dim_feat, hid), lambda i: (0, 0)),
                pl.BlockSpec((1, hid), lambda i: (0, 0)),
                pl.BlockSpec((hid, dim_latent), lambda i: (0, 0)),
                pl.BlockSpec((1, dim_latent), lambda i: (0, 0)),
                pl.BlockSpec((dim_latent, dim_latent), lambda i: (0, 0)),
            ],
            out_specs=pl.BlockSpec((mlp_block, dim_latent), lambda i: (i, 0)),
            compiler_params=pltpu.CompilerParams(
                dimension_semantics=("parallel",),
                vmem_limit_bytes=vmem_limit),
        )(feats_p, w1, b1, w2, b2, wg)
    else:
        # dim_latent falsy: module convolves raw features; pre-apply Wg only.
        dim_latent = wg.shape[1]
        temp_w = pl.pallas_call(
            functools.partial(_proj_kernel, precision=precision),
            out_shape=jax.ShapeDtypeStruct((n_pad, dim_latent), gcn_dtype),
            grid=(n_pad // mlp_block,),
            in_specs=[
                pl.BlockSpec((mlp_block, dim_feat), lambda i: (i, 0)),
                pl.BlockSpec((dim_feat, dim_latent), lambda i: (0, 0)),
            ],
            out_specs=pl.BlockSpec((mlp_block, dim_latent), lambda i: (i, 0)),
            compiler_params=pltpu.CompilerParams(
                dimension_semantics=("parallel",),
                vmem_limit_bytes=vmem_limit),
        )(feats_p, wg)

    # ---- h = aggregate_{j->i} tempW[j]  over edge_index ----------------------- #
    # TODO(synk): ItemGCN / ItemNormGAT / ItemGateGAT class definitions are not in
    # the spec; this implements the standard MMGCN-style ItemGCN (linear transform
    # + add/mean neighbor aggregation over edge_index).  GAT variants not implemented.
    src = edge_index[0].astype(jnp.int32)
    dst = edge_index[1].astype(jnp.int32)
    # Build exact multiplicity counts in f32, then cast to the (bf16) contraction
    # dtype; small integer counts are exactly representable there.
    adj = (jnp.zeros((n_pad, n_pad), jnp.float32)
              .at[dst, src].add(1.0)).astype(gcn_dtype)

    if aggr == "mean":
        deg = jnp.zeros((n_pad,), jnp.float32).at[dst].add(1.0)   # O(E), no O(N^2) pass
        scale = (1.0 / jnp.maximum(deg, 1.0)).reshape(n_pad, 1)
    else:
        scale = jnp.ones((n_pad, 1), jnp.float32)

    # Keep tempW fully VMEM-resident when it fits (removes N/block_m re-reads of it);
    # otherwise stream K-tiles of it alongside the adjacency stream.
    temp_bytes = n_pad * dim_latent * jnp.dtype(gcn_dtype).itemsize
    resident_x = (2 * temp_bytes) <= (vmem_limit // 3)
    if resident_x:
        x_spec = pl.BlockSpec((n_pad, dim_latent), lambda i, k: (0, 0))
    else:
        x_spec = pl.BlockSpec((gcn_block_k, dim_latent), lambda i, k: (k, 0))

    h = pl.pallas_call(
        functools.partial(_gcn_kernel, precision=precision,
                          block_k=gcn_block_k, resident_x=resident_x),
        out_shape=jax.ShapeDtypeStruct((n_pad, dim_latent), out_dtype),
        grid=(n_pad // gcn_block_m, n_pad // gcn_block_k),     # (row tiles, K tiles)
        in_specs=[
            pl.BlockSpec((gcn_block_m, gcn_block_k), lambda i, k: (i, k)),
            x_spec,
            pl.BlockSpec((gcn_block_m, 1), lambda i, k: (i, 0)),
        ],
        out_specs=pl.BlockSpec((gcn_block_m, dim_latent), lambda i, k: (i, 0)),
        scratch_shapes=[pltpu.VMEM((gcn_block_m, dim_latent), jnp.float32)],
        compiler_params=pltpu.CompilerParams(
            dimension_semantics=("parallel", "arbitrary"),
            vmem_limit_bytes=vmem_limit),
    )(adj, temp_w, scale)

    return h[:N]


if __name__ == "__main__":
    key = jax.random.PRNGKey(0)
    kf, ke, k1, k2, k3, k4, k5 = jax.random.split(key, 7)

    # small shapes consistent with the module:
    #   N items, E edges, dim_feat feature width, dim_latent latent width
    N, E = 200, 800
    dim_feat, dim_latent = 96, 64
    hid = 4 * dim_latent

    features = jax.random.normal(kf, (N, dim_feat), dtype=jnp.float32)
    edge_index = jax.random.randint(ke, (2, E), 0, N, dtype=jnp.int32)

    params = dict(
        w1=jax.random.normal(k1, (dim_feat, hid), jnp.float32) / np.sqrt(dim_feat),
        b1=jax.random.normal(k2, (1, hid), jnp.float32) * 0.1,
        w2=jax.random.normal(k3, (hid, dim_latent), jnp.float32) / np.sqrt(hid),
        b2=jax.random.normal(k4, (1, dim_latent), jnp.float32) * 0.1,
        wg=jax.random.normal(k5, (dim_latent, dim_latent), jnp.float32) / np.sqrt(dim_latent),
    )

    # pure-JAX f32 reference of the PyTorch forward
    hp = jax.lax.Precision.HIGHEST
    t = jnp.dot(features, params["w1"], precision=hp) + params["b1"]
    t = jnp.where(t >= 0, t, _LEAKY_SLOPE * t)
    temp_ref = jnp.dot(t, params["w2"], precision=hp) + params["b2"]
    adj_ref = jnp.zeros((N, N), jnp.float32).at[edge_index[1], edge_index[0]].add(1.0)
    ref_add = jnp.dot(jnp.dot(adj_ref, temp_ref, precision=hp), params["wg"], precision=hp)
    deg_ref = jnp.maximum(adj_ref.sum(axis=1, keepdims=True), 1.0)
    ref_mean = jnp.dot(jnp.dot(adj_ref / deg_ref, temp_ref, precision=hp),
                       params["wg"], precision=hp)

    # 1) Production config: bf16 adjacency/tempW, default MXU precision.
    #    Loose sanity check only (reduced precision is intentional here).
    h_prod = item_gcn_forward(features, edge_index, params, aggr="add")
    h_prod = jax.block_until_ready(h_prod)
    assert h_prod.shape == (N, dim_latent) and h_prod.dtype == features.dtype
    assert bool(jnp.all(jnp.isfinite(h_prod)))
    np.testing.assert_allclose(np.asarray(h_prod), np.asarray(ref_add), rtol=1e-1, atol=2e-1)

    # 2) Correctness config: f32 contraction + HIGHEST precision — tight check.
    h_f32 = item_gcn_forward(features, edge_index, params, aggr="add",
                             gcn_dtype=jnp.float32, precision=hp)
    h_f32 = jax.block_until_ready(h_f32)
    np.testing.assert_allclose(np.asarray(h_f32), np.asarray(ref_add), rtol=1e-4, atol=1e-4)

    h_mean = item_gcn_forward(features, edge_index, params, aggr="mean",
                              gcn_dtype=jnp.float32, precision=hp)
    h_mean = jax.block_until_ready(h_mean)
    np.testing.assert_allclose(np.asarray(h_mean), np.asarray(ref_mean), rtol=1e-4, atol=1e-4)

    print("KERNEL_OK")
</pallas_src>

<mosaic_0001>
module attributes {stable_mosaic.version = 11 : i64} {
  func.func @_mlp_kernel(%arg0: i32, %arg1: memref<512x96xf32, #tpu.memory_space<vmem>>, %arg2: memref<96x256xf32, #tpu.memory_space<vmem>>, %arg3: memref<1x256xf32, #tpu.memory_space<vmem>>, %arg4: memref<256x64xf32, #tpu.memory_space<vmem>>, %arg5: memref<1x64xf32, #tpu.memory_space<vmem>>, %arg6: memref<64x64xf32, #tpu.memory_space<vmem>>, %arg7: memref<512x64xbf16, #tpu.memory_space<vmem>>) attributes {dimension_semantics = [#tpu.dimension_semantics<parallel>], iteration_bounds = array<i64: 1>, scalar_prefetch = 0 : i64, scratch_operands = 0 : i64, tpu.core_type = #tpu.core_type<tc>, window_params = [{transform_indices = @transform_0, window_bounds = array<i64: 512, 96>}, {pipeline_mode = #tpu.pipeline_mode<synchronous>, transform_indices = @transform_1, window_bounds = array<i64: 96, 256>}, {pipeline_mode = #tpu.pipeline_mode<synchronous>, transform_indices = @transform_2, window_bounds = array<i64: 1, 256>}, {pipeline_mode = #tpu.pipeline_mode<synchronous>, transform_indices = @transform_3, window_bounds = array<i64: 256, 64>}, {pipeline_mode = #tpu.pipeline_mode<synchronous>, transform_indices = @transform_4, window_bounds = array<i64: 1, 64>}, {pipeline_mode = #tpu.pipeline_mode<synchronous>, transform_indices = @transform_5, window_bounds = array<i64: 64, 64>}, {transform_indices = @transform_6, window_bounds = array<i64: 512, 64>}]} {
    %c0 = arith.constant 0 : index
    %c0_0 = arith.constant 0 : index
    %0 = vector.load %arg1[%c0, %c0_0] : memref<512x96xf32, #tpu.memory_space<vmem>>, vector<512x96xf32>
    %c0_1 = arith.constant 0 : index
    %c0_2 = arith.constant 0 : index
    %1 = vector.load %arg2[%c0_1, %c0_2] : memref<96x256xf32, #tpu.memory_space<vmem>>, vector<96x256xf32>
    %cst = arith.constant dense<0.000000e+00> : vector<512x256xf32>
    %2 = tpu.matmul %0, %1, %cst {dimension_numbers = #tpu.dot_dimension_numbers<[1], [0], [0], [1], [0, 0, 1, 1], [], []>} : vector<512x96xf32>, vector<96x256xf32>, vector<512x256xf32> -> vector<512x256xf32>
    %c0_3 = arith.constant 0 : index
    %c0_4 = arith.constant 0 : index
    %3 = vector.load %arg3[%c0_3, %c0_4] : memref<1x256xf32, #tpu.memory_space<vmem>>, vector<1x256xf32>
    %4 = vector.broadcast %3 : vector<1x256xf32> to vector<512x256xf32>
    %5 = arith.addf %2, %4 : vector<512x256xf32>
    %cst_5 = arith.constant 0.000000e+00 : f32
    %6 = vector.broadcast %cst_5 : f32 to vector<512x256xf32>
    %7 = arith.cmpf oge, %5, %6 : vector<512x256xf32>
    %cst_6 = arith.constant 0.00999999977 : f32
    %8 = vector.broadcast %cst_6 : f32 to vector<512x256xf32>
    %9 = arith.mulf %8, %5 : vector<512x256xf32>
    %10 = arith.select %7, %5, %9 : vector<512x256xi1>, vector<512x256xf32>
    %c0_7 = arith.constant 0 : index
    %c0_8 = arith.constant 0 : index
    %11 = vector.load %arg4[%c0_7, %c0_8] : memref<256x64xf32, #tpu.memory_space<vmem>>, vector<256x64xf32>
    %cst_9 = arith.constant dense<0.000000e+00> : vector<512x64xf32>
    %12 = tpu.matmul %10, %11, %cst_9 {dimension_numbers = #tpu.dot_dimension_numbers<[1], [0], [0], [1], [0, 0, 1, 1], [], []>} : vector<512x256xf32>, vector<256x64xf32>, vector<512x64xf32> -> vector<512x64xf32>
    %c0_10 = arith.constant 0 : index
    %c0_11 = arith.constant 0 : index
    %13 = vector.load %arg5[%c0_10, %c0_11] : memref<1x64xf32, #tpu.memory_space<vmem>>, vector<1x64xf32>
    %14 = vector.broadcast %13 : vector<1x64xf32> to vector<512x64xf32>
    %15 = arith.addf %12, %14 : vector<512x64xf32>
    %c0_12 = arith.constant 0 : index
    %c0_13 = arith.constant 0 : index
    %16 = vector.load %arg6[%c0_12, %c0_13] : memref<64x64xf32, #tpu.memory_space<vmem>>, vector<64x64xf32>
    %cst_14 = arith.constant dense<0.000000e+00> : vector<512x64xf32>
    %17 = tpu.matmul %15, %16, %cst_14 {dimension_numbers = #tpu.dot_dimension_numbers<[1], [0], [0], [1], [0, 0, 1, 1], [], []>} : vector<512x64xf32>, vector<64x64xf32>, vector<512x64xf32> -> vector<512x64xf32>
    %18 = arith.truncf %17 : vector<512x64xf32> to vector<512x64xbf16>
    %c0_15 = arith.constant 0 : index
    %c0_16 = arith.constant 0 : index
    %19 = vector.load %arg7[%c0_15, %c0_16] : memref<512x64xbf16, #tpu.memory_space<vmem>>, vector<512x64xbf16>
    tpu.vector_store %arg7[%c0_15, %c0_16], %18 {strides = array<i32>} : memref<512x64xbf16, #tpu.memory_space<vmem>>, vector<512x64xbf16>,
    return
  }
  func.func @transform_0(%arg0: i32) -> (i32, i32) {
    %c0_i32 = arith.constant 0 : i32
    %c0_i32_0 = arith.constant 0 : i32
    return %arg0, %c0_i32 : i32, i32
  }
  func.func @transform_1(%arg0: i32) -> (i32, i32) {
    %c0_i32 = arith.constant 0 : i32
    %c0_i32_0 = arith.constant 0 : i32
    %c0_i32_1 = arith.constant 0 : i32
    return %c0_i32, %c0_i32_0 : i32, i32
  }
  func.func @transform_2(%arg0: i32) -> (i32, i32) {
    %c0_i32 = arith.constant 0 : i32
    %c0_i32_0 = arith.constant 0 : i32
    %c0_i32_1 = arith.constant 0 : i32
    return %c0_i32, %c0_i32_0 : i32, i32
  }
  func.func @transform_3(%arg0: i32) -> (i32, i32) {
    %c0_i32 = arith.constant 0 : i32
    %c0_i32_0 = arith.constant 0 : i32
    %c0_i32_1 = arith.constant 0 : i32
    return %c0_i32, %c0_i32_0 : i32, i32
  }
  func.func @transform_4(%arg0: i32) -> (i32, i32) {
    %c0_i32 = arith.constant 0 : i32
    %c0_i32_0 = arith.constant 0 : i32
    %c0_i32_1 = arith.constant 0 : i32
    return %c0_i32, %c0_i32_0 : i32, i32
  }
  func.func @transform_5(%arg0: i32) -> (i32, i32) {
    %c0_i32 = arith.constant 0 : i32
    %c0_i32_0 = arith.constant 0 : i32
    %c0_i32_1 = arith.constant 0 : i32
    return %c0_i32, %c0_i32_0 : i32, i32
  }
  func.func @transform_6(%arg0: i32) -> (i32, i32) {
    %c0_i32 = arith.constant 0 : i32
    %c0_i32_0 = arith.constant 0 : i32
    return %arg0, %c0_i32 : i32, i32
  }
}

</mosaic_0001>

<bundles_post_ra>
// kernel: tpu_custom_call.1
= control target key start
LH: loop header
LB: loop body
LE: loop exit
PB: predicated region body
PF: predicated region fallthrough
CT: control target
= control target key end

     0   :  { %11 = vsyncpa [#allocation3], 0  ;;  %s4008_s0 = inlined_call_operand.hbm [shape: f32[512,96], index: 0, kind: input, shape index: {}]   ;;  %s4009_s1 = inlined_call_operand.hbm [shape: f32[96,256], index: 1, kind: input, shape index: {}]   ;;  %s4010_s2 = inlined_call_operand.hbm [shape: f32[1,256], index: 2, kind: input, shape index: {}]   ;;  %s4011_s3 = inlined_call_operand.hbm [shape: f32[256,64], index: 3, kind: input, shape index: {}]   ;;  %s4012_s4 = inlined_call_operand.hbm [shape: f32[1,64], index: 4, kind: input, shape index: {}]   ;;  %s4013_s5 = inlined_call_operand.hbm [shape: f32[64,64], index: 5, kind: input, shape index: {}]   ;;  %s4014_s6 = inlined_call_operand.hbm [shape: bf16[512,64], index: 6, kind: output, shape index: {}]  }
   0x1   :  { %12 = vsyncpa [#allocation6], 0 }
   0x2   :  { %13 = vsyncpa [#allocation9], 0 }
   0x3   :  { %14 = vsyncpa [#allocation12], 0 }
   0x4   :  { %15 = vsyncpa [#allocation4], 0  ;;  %s3299_s21 = smov [#allocation5]   ;;  %s3135_s25 = scalar_lea.hbm %s4009_s1, 3072 }
   0x5   :  { %s33_s22 = sshll.u32 %s3299_s21, 4  ;;  %p3136_p0 = scmp.ne.s32.totalorder %s4009_s1, %s3135_s25  ;;  %s34_s22 = int_to_ptr.vmem [resolvable:$true] %s33_s22 }
   0x6   :  { %p3139_p1 = scmp.lt.u32.totalorder %s3135_s25, %s4009_s1 }
   0x8   :  { %p3141_p2 = pnand %p3139_p1, %p3136_p0 }
   0xa   :  { %3144 = shalt.err (!%p3141_p2)
}
   0xb   :  { %s3145_s30 = scalar_lea.vmem %s34_s22, 3072  ;;  %p3150_p4 = scmp.lt.s32.totalorder %s34_s22, %s34_s22 }
   0xc   :  { %p3146_p3 = scmp.ne.s32.totalorder %s34_s22, %s3145_s30  ;;  %p3151_p5 = scmp.lt.s32.totalorder %s3145_s30, %s3145_s30 }
   0xe   :  { %p3152_p6 = por %p3151_p5, %p3150_p4 }
  0x10   :  { %p3153_p7 = pnand %p3152_p6, %p3146_p3 }
  0x12   :  { %3156 = shalt.err (!%p3153_p7)
}
  0x13   :  { %s3300_s7 = smov 256   ;;  %s3301_s8 = smov 16  }
  0x14   :  { %39 = dma.hbm_to_vmem [thread:$0]  %s4009_s1, 3072, %s34_s22, [#allocation6], %s3300_s7, %s3300_s7, %s3301_s8  }
  0x15   :  { %s3302_s11 = smov [#allocation8]   ;;  %s3303_s13 = smov [#allocation2]  }
  0x16   :  { %s55_s12 = sshll.u32 %s3302_s11, 4  ;;  %s21_s14 = sshll.u32 %s3303_s13, 4  ;;  %s56_s12 = int_to_ptr.vmem [resolvable:$true] %s55_s12  ;;  %s22_s14 = int_to_ptr.vmem [resolvable:$true] %s21_s14 }
  0x17   :  { %s3157_s17 = scalar_lea.hbm %s4011_s3, 4096 }
  0x18   :  { %p3158_p8 = scmp.ne.s32.totalorder %s4011_s3, %s3157_s17  ;;  %p3161_p9 = scmp.lt.u32.totalorder %s3157_s17, %s4011_s3 }
  0x1a   :  { %p3163_p10 = pnand %p3161_p9, %p3158_p8 }
  0x1c   :  { %3166 = shalt.err (!%p3163_p10)
}
  0x1d   :  { %s3167_s1 = scalar_lea.vmem %s56_s12, 4096  ;;  %p3172_p12 = scmp.lt.s32.totalorder %s56_s12, %s56_s12 }
  0x1e   :  { %p3168_p11 = scmp.ne.s32.totalorder %s56_s12, %s3167_s1  ;;  %p3173_p13 = scmp.lt.s32.totalorder %s3167_s1, %s3167_s1 }
  0x20   :  { %p3174_p0 = por %p3173_p13, %p3172_p12 }
  0x22   :  { %p3175_p1 = pnand %p3174_p0, %p3168_p11 }
  0x24   :  { %3178 = shalt.err (!%p3175_p1)
}
  0x25   :  { %s3304_s22 = smov 128   ;;  %s3305_s23 = smov 8  }
  0x26   :  { %61 = dma.hbm_to_vmem [thread:$0]  %s4011_s3, 4096, %s56_s12, [#allocation9], %s3304_s22, %s3304_s22, %s3305_s23  }
  0x27   :  { %s3179_s28 = scalar_lea.hbm %s4008_s0, 8192 }
  0x28   :  { %p3180_p2 = scmp.ne.s32.totalorder %s4008_s0, %s3179_s28  ;;  %p3183_p3 = scmp.lt.u32.totalorder %s3179_s28, %s4008_s0 }
  0x2a   :  { %p3185_p4 = pnand %p3183_p3, %p3180_p2 }
  0x2c   :  { %3188 = shalt.err (!%p3185_p4)
}
  0x2d   :  { %s3189_s9 = scalar_lea.vmem %s22_s14, 8192  ;;  %p3194_p6 = scmp.lt.s32.totalorder %s22_s14, %s22_s14 }
  0x2e   :  { %p3190_p5 = scmp.ne.s32.totalorder %s22_s14, %s3189_s9  ;;  %p3195_p7 = scmp.lt.s32.totalorder %s3189_s9, %s3189_s9 }
  0x30   :  { %p3196_p8 = por %p3195_p7, %p3194_p6 }
  0x32   :  { %p3197_p9 = pnand %p3196_p8, %p3190_p5 }
  0x34   :  { %3200 = shalt.err (!%p3197_p9)
}
  0x35   :  { %27 = dma.hbm_to_vmem [thread:$0]  %s4008_s0, 8192, %s22_s14, [#allocation3], %s3304_s22, %s3304_s22, %s3305_s23  }
  0x36   :  { %s3306_s11 = smov [#allocation7]   ;;  %s3307_s13 = smov [#allocation10]  }
  0x37   :  { %s46_s12 = sshll.u32 %s3306_s11, 4  ;;  %s68_s15 = sshll.u32 %s3307_s13, 4  ;;  %s47_s12 = int_to_ptr.vmem [resolvable:$true] %s46_s12  ;;  %s69_s15 = int_to_ptr.vmem [resolvable:$true] %s68_s15 }
  0x38   :  { %s3201_s18 = scalar_lea.hbm %s4010_s2, 32 }
  0x39   :  { %p3202_p10 = scmp.ne.s32.totalorder %s4010_s2, %s3201_s18  ;;  %p3205_p11 = scmp.lt.u32.totalorder %s3201_s18, %s4010_s2 }
  0x3b   :  { %p3207_p12 = pnand %p3205_p11, %p3202_p10 }
  0x3d   :  { %3210 = shalt.err (!%p3207_p12)
}
  0x3e   :  { %s3211_s0 = scalar_lea.vmem %s47_s12, 32  ;;  %p3216_p0 = scmp.lt.s32.totalorder %s47_s12, %s47_s12 }
  0x3f   :  { %p3212_p13 = scmp.ne.s32.totalorder %s47_s12, %s3211_s0  ;;  %p3217_p1 = scmp.lt.s32.totalorder %s3211_s0, %s3211_s0 }
  0x41   :  { %p3218_p2 = por %p3217_p1, %p3216_p0 }
  0x43   :  { %p3219_p3 = pnand %p3218_p2, %p3212_p13 }
  0x45   :  { %3222 = shalt.err (!%p3219_p3)
}
  0x46   :  { %49 = dma.hbm_to_vmem [thread:$0]  %s4010_s2, 32, %s47_s12, [#allocation6]  }
  0x47   :  { %s3223_s27 = scalar_lea.hbm %s4012_s4, 16 }
  0x48   :  { %p3224_p4 = scmp.ne.s32.totalorder %s4012_s4, %s3223_s27  ;;  %p3227_p5 = scmp.lt.u32.totalorder %s3223_s27, %s4012_s4 }
  0x4a   :  { %p3229_p6 = pnand %p3227_p5, %p3224_p4 }
  0x4c   :  { %3232 = shalt.err (!%p3229_p6)
}
  0x4d   :  { %s3233_s8 = scalar_lea.vmem %s69_s15, 16  ;;  %s3237_s9 = scalar_lea.vmem %s69_s15, 32 }
  0x4e   :  { %p3234_p7 = scmp.ne.s32.totalorder %s69_s15, %s3233_s8  ;;  %p3238_p8 = scmp.lt.s32.totalorder %s69_s15, %s69_s15 }
  0x4f   :  { %p3239_p9 = scmp.lt.s32.totalorder %s3237_s9, %s3233_s8 }
  0x51   :  { %p3240_p10 = por %p3239_p9, %p3238_p8 }
  0x53   :  { %p3241_p11 = pnand %p3240_p10, %p3234_p7 }
  0x55   :  { %3244 = shalt.err (!%p3241_p11)
}
  0x56   :  { %71 = dma.hbm_to_vmem [thread:$0]  %s4012_s4, 16, %s69_s15, [#allocation9]  }
  0x57   :  { %s3308_s10 = smov [#allocation11]   ;;  %s3245_s16 = scalar_lea.hbm %s4013_s5, 1024 }
  0x58   :  { %s77_s11 = sshll.u32 %s3308_s10, 4  ;;  %p3246_p12 = scmp.ne.s32.totalorder %s4013_s5, %s3245_s16  ;;  %s78_s11 = int_to_ptr.vmem [resolvable:$true] %s77_s11 }
  0x59   :  { %p3249_p13 = scmp.lt.u32.totalorder %s3245_s16, %s4013_s5 }
  0x5b   :  { %p3251_p0 = pnand %p3249_p13, %p3246_p12 }
  0x5d   :  { %3254 = shalt.err (!%p3251_p0)
}
  0x5e   :  { %s3255_s21 = scalar_lea.vmem %s78_s11, 1024  ;;  %p3260_p2 = scmp.lt.s32.totalorder %s78_s11, %s78_s11 }
  0x5f   :  { %p3256_p1 = scmp.ne.s32.totalorder %s78_s11, %s3255_s21  ;;  %p3261_p3 = scmp.lt.s32.totalorder %s3255_s21, %s3255_s21 }
  0x61   :  { %p3262_p4 = por %p3261_p3, %p3260_p2 }
  0x63   :  { %p3263_p5 = pnand %p3262_p4, %p3256_p1 }
  0x65   :  { %3266 = shalt.err (!%p3263_p5)
}
  0x66   :  { %83 = dma.hbm_to_vmem [thread:$0]  %s4013_s5, 1024, %s78_s11, [#allocation12], %s3304_s22, %s3304_s22, %s3305_s23  }
  0x67   :  { %3289 = dma.done.wait [#allocation3], 8192  }
  0x68   :  { %3290 = vsyncadd [#allocation3], 4294959104 }
  0x69   :  { %3291 = dma.done.wait [#allocation6], 3104  }
  0x6a   :  { %3292 = vsyncadd [#allocation6], 4294964192 }
  0x6b   :  { %3293 = dma.done.wait [#allocation9], 4112  }
  0x6c   :  { %3294 = vsyncadd [#allocation9], 4294963184 }
  0x6d   :  { %3295 = dma.done.wait [#allocation12], 1024  }
  0x6e   :  { %3296 = vsyncadd [#allocation12], 4294966272  ;;  %v3309_v0 = vmov 0.0   ;;  %v167_v1 = vld [vmem:[#allocation5 + $0x8] sm:$0xff]  ;;  %v169_v2 = vld [vmem:[#allocation5 + $0x18] sm:$0xff]  ;;  %vm202_vm0 = vcmask 785408  }
  0x6f   :  { %459 = vmatprep.mubr.f32.mxu0 %v3309_v0  ;;  %747 = vmatprep.mubr.f32.mxu1 %v3309_v0  ;;  %v166_v3 = vld [vmem:[#allocation5] sm:$0xff]  ;;  %v3020_v4 = vpack.c.bf16 %v169_v2, %v167_v1  ;;  %v168_v5 = vld [vmem:[#allocation5 + $0x10] sm:$0xff]  ;;  %v171_v6 = vld [vmem:[#allocation5 + $0x28] sm:$0xff]  ;;  %v3310_v46 = vmov 0.0|0.0   ;;  %s3311_s5 = smov [#allocation13]  }
  0x70   :  { %v173_v7 = vld [vmem:[#allocation5 + $0x38] sm:$0xff]  ;;  %v3022_v8 = vpack.c.bf16 %v168_v5, %v166_v3  ;;  %v170_v10 = vld [vmem:[#allocation5 + $0x20] sm:$0xff]  ;;  %v172_v11 = vld [vmem:[#allocation5 + $0x30] sm:$0xff]  ;;  %s2564_s22 = sshll.u32 %s3311_s5, 4  ;;  %s2565_s22 = int_to_ptr.vmem [resolvable:$true] %s2564_s22 }
  0x71   :  { %v3024_v9 = vpack.c.bf16 %v173_v7, %v171_v6  ;;  %v175_v12 = vld [vmem:[#allocation5 + $0x48] sm:$0xff]  ;;  %3021 = vmatprep.subr.bf16.mxu0 %v3020_v4  ;;  %v177_v13 = vld [vmem:[#allocation5 + $0x58] sm:$0xff]  ;;  %3108 = vmatprep.subr.bf16.mxu1 %v3020_v4  ;;  %v3026_v14 = vpack.c.bf16 %v172_v11, %v170_v10  ;;  %v174_v16 = vld [vmem:[#allocation5 + $0x40] sm:$0xff]  ;;  %s3267_s23 = scalar_lea.vmem %s2565_s22, 4096  ;;  %p3272_p7 = scmp.lt.s32.totalorder %s2565_s22, %s2565_s22 }
  0x72   :  { %3023 = vmatpush1.bf16.msra.mxu0 %v3022_v8  ;;  %3114 = vmatpush1.bf16.msra.mxu1 %v3022_v8  ;;  %v3028_v15 = vpack.c.bf16 %v177_v13, %v175_v12  ;;  %v176_v17 = vld [vmem:[#allocation5 + $0x50] sm:$0xff]  ;;  %v179_v18 = vld [vmem:[#allocation5 + $0x68] sm:$0xff]  ;;  %v181_v19 = vld [vmem:[#allocation5 + $0x78] sm:$0xff]  ;;  %p3268_p6 = scmp.ne.s32.totalorder %s2565_s22, %s3267_s23  ;;  %p3273_p8 = scmp.lt.s32.totalorder %s3267_s23, %s3267_s23 }
  0x73   :  { %3025 = vmatprep.subr.bf16.mxu0 %v3024_v9  ;;  %3109 = vmatprep.subr.bf16.mxu1 %v3024_v9  ;;  %v3030_v20 = vpack.c.bf16 %v176_v17, %v174_v16  ;;  %v3032_v21 = vpack.c.bf16 %v181_v19, %v179_v18  ;;  %v178_v22 = vld [vmem:[#allocation5 + $0x60] sm:$0xff]  ;;  %v180_v23 = vld [vmem:[#allocation5 + $0x70] sm:$0xff]  ;;  %v183_v24 = vld [vmem:[#allocation5 + $0x88] sm:$0xff] }
  0x74   :  { %v185_v25 = vld [vmem:[#allocation5 + $0x98] sm:$0xff]  ;;  %v3034_v26 = vpack.c.bf16 %v180_v23, %v178_v22  ;;  %v182_v28 = vld [vmem:[#allocation5 + $0x80] sm:$0xff]  ;;  %v184_v29 = vld [vmem:[#allocation5 + $0x90] sm:$0xff]  ;;  %p3274_p9 = por %p3273_p8, %p3272_p7 }
  0x75   :  { %v3036_v27 = vpack.c.bf16 %v185_v25, %v183_v24  ;;  %v187_v30 = vld [vmem:[#allocation5 + $0xa8] sm:$0xff]  ;;  %v189_v31 = vld [vmem:[#allocation5 + $0xb8] sm:$0xff]  ;;  %v3038_v32 = vpack.c.bf16 %v184_v29, %v182_v28  ;;  %v186_v34 = vld [vmem:[#allocation5 + $0xa0] sm:$0xff] }
  0x76   :  { %3027 = vmatpush1.bf16.msra.mxu0 %v3026_v14  ;;  %3115 = vmatpush1.bf16.msra.mxu1 %v3026_v14  ;;  %v3040_v33 = vpack.c.bf16 %v189_v31, %v187_v30  ;;  %v188_v35 = vld [vmem:[#allocation5 + $0xb0] sm:$0xff]  ;;  %v102_v37 = vld [vmem:[#allocation2] sm:$0xff]  ;;  %v103_v38 = vld [vmem:[#allocation2 + $0x8] sm:$0xff]  ;;  %p3275_p10 = pnand %p3274_p9, %p3268_p6 }
  0x77   :  { %3029 = vmatprep.subr.bf16.mxu0 %v3028_v15  ;;  %3110 = vmatprep.subr.bf16.mxu1 %v3028_v15  ;;  %v3042_v36 = vpack.c.bf16 %v188_v35, %v186_v34  ;;  %v104_v39 = vld [vmem:[#allocation2 + $0x10] sm:$0xff]  ;;  %v105_v40 = vld [vmem:[#allocation2 + $0x18] sm:$0xff]  ;;  %v106_v41 = vld [vmem:[#allocation2 + $0x20] sm:$0xff] }
  0x78   :  { %v107_v42 = vld [vmem:[#allocation2 + $0x28] sm:$0xff]  ;;  %v108_v43 = vld [vmem:[#allocation2 + $0x30] sm:$0xff]  ;;  %v150_v44 = vld [vmem:[#allocation2 + $0x180] sm:$0xff] }
  0x79   :  { %v109_v45 = vld [vmem:[#allocation2 + $0x38] sm:$0xff]  ;;  %v1228_v47 = vld [vmem:[#allocation8] sm:$0xff]  ;;  %v1229_v48 = vld [vmem:[#allocation8 + $0x8] sm:$0xff] }
  0x7a   :  { %3031 = vmatpush1.bf16.msra.mxu0 %v3030_v20  ;;  %3116 = vmatpush1.bf16.msra.mxu1 %v3030_v20  ;;  %v3045_v49 = vpack.c.bf16 %v1229_v48, %v1228_v47  ;;  %v151_v50 = vld [vmem:[#allocation2 + $0x188] sm:$0xff]  ;;  %v110_v51 = vld [vmem:[#allocation2 + $0x40] sm:$0xff]  ;;  %v1230_v52 = vld [vmem:[#allocation8 + $0x10] sm:$0xff] }
  0x7b   :  { %3033 = vmatprep.subr.bf16.mxu0 %v3032_v21  ;;  %3111 = vmatprep.subr.bf16.mxu1 %v3032_v21  ;;  %v1231_v53 = vld [vmem:[#allocation8 + $0x18] sm:$0xff]  ;;  %v152_v55 = vld [vmem:[#allocation2 + $0x190] sm:$0xff]  ;;  %v111_v56 = vld [vmem:[#allocation2 + $0x48] sm:$0xff] }
  0x7c   :  { %v3048_v54 = vpack.c.bf16 %v1231_v53, %v1230_v52  ;;  %v1232_v57 = vld [vmem:[#allocation8 + $0x20] sm:$0xff]  ;;  %v1233_v58 = vld [vmem:[#allocation8 + $0x28] sm:$0xff]  ;;  %v153_v60 = vld [vmem:[#allocation2 + $0x198] sm:$0xff] }
  0x7d   :  { %v3051_v59 = vpack.c.bf16 %v1233_v58, %v1232_v57  ;;  %v112_v61 = vld [vmem:[#allocation2 + $0x50] sm:$0xff]  ;;  %v1235_v63 = vld [vmem:[#allocation8 + $0x38] sm:$0xff]  ;;  %v1236_v4 = vld [vmem:[#allocation8 + $0x40] sm:$0xff] }
  0x7e   :  { %3035 = vmatpush1.bf16.msra.mxu0 %v3034_v26  ;;  %3117 = vmatpush1.bf16.msra.mxu1 %v3034_v26  ;;  %v1234_v62 = vld [vmem:[#allocation8 + $0x30] sm:$0xff]  ;;  %v154_v2 = vld [vmem:[#allocation2 + $0x1a0] sm:$0xff]  ;;  %v1237_v5 = vld [vmem:[#allocation8 + $0x48] sm:$0xff] }
  0x7f   :  { %3037 = vmatprep.subr.bf16.mxu0 %v3036_v27  ;;  %3112 = vmatprep.subr.bf16.mxu1 %v3036_v27  ;;  %v3054_v1 = vpack.c.bf16 %v1235_v63, %v1234_v62  ;;  %v113_v3 = vld [vmem:[#allocation2 + $0x58] sm:$0xff]  ;;  %v3057_v6 = vpack.c.bf16 %v1237_v5, %v1236_v4  ;;  %v155_v7 = vld [vmem:[#allocation2 + $0x1a8] sm:$0xff]  ;;  %v114_v8 = vld [vmem:[#allocation2 + $0x60] sm:$0xff] }
  0x80   :  { %v1238_v9 = vld [vmem:[#allocation8 + $0x50] sm:$0xff]  ;;  %v1239_v10 = vld [vmem:[#allocation8 + $0x58] sm:$0xff]  ;;  %v115_v13 = vld [vmem:[#allocation2 + $0x68] sm:$0xff] }
  0x81   :  { %v3060_v11 = vpack.c.bf16 %v1239_v10, %v1238_v9  ;;  %v156_v12 = vld [vmem:[#allocation2 + $0x1b0] sm:$0xff]  ;;  %v1240_v14 = vld [vmem:[#allocation8 + $0x60] sm:$0xff]  ;;  %v157_v17 = vld [vmem:[#allocation2 + $0x1b8] sm:$0xff] }
  0x82   :  { %3039 = vmatpush1.bf16.msra.mxu0 %v3038_v32  ;;  %3118 = vmatpush1.bf16.msra.mxu1 %v3038_v32  ;;  %v1241_v15 = vld [vmem:[#allocation8 + $0x68] sm:$0xff]  ;;  %v1242_v19 = vld [vmem:[#allocation8 + $0x70] sm:$0xff]  ;;  %v1243_v20 = vld [vmem:[#allocation8 + $0x78] sm:$0xff] }
  0x83   :  { %3041 = vmatprep.subr.bf16.mxu0 %v3040_v33  ;;  %3113 = vmatprep.subr.bf16.mxu1 %v3040_v33  ;;  %v3063_v16 = vpack.c.bf16 %v1241_v15, %v1240_v14  ;;  %v116_v18 = vld [vmem:[#allocation2 + $0x70] sm:$0xff]  ;;  %v3066_v21 = vpack.c.bf16 %v1243_v20, %v1242_v19  ;;  %v158_v22 = vld [vmem:[#allocation2 + $0x1c0] sm:$0xff]  ;;  %v117_v23 = vld [vmem:[#allocation2 + $0x78] sm:$0xff] }
  0x84   :  { %v1244_v24 = vld [vmem:[#allocation8 + $0x80] sm:$0xff]  ;;  %v1245_v25 = vld [vmem:[#allocation8 + $0x88] sm:$0xff]  ;;  %v1246_v28 = vld [vmem:[#allocation8 + $0x90] sm:$0xff] }
  0x85   :  { %v3069_v26 = vpack.c.bf16 %v1245_v25, %v1244_v24  ;;  %v159_v27 = vld [vmem:[#allocation2 + $0x1c8] sm:$0xff]  ;;  %v1247_v29 = vld [vmem:[#allocation8 + $0x98] sm:$0xff]  ;;  %v160_v34 = vld [vmem:[#allocation2 + $0x1d0] sm:$0xff]  ;;  %v192_v24 = vlaneseq }
  0x86   :  { %3043 = vmatpush1.bf16.msra.mxu0 %v3042_v36  ;;  %3119 = vmatpush1.bf16.msra.mxu1 %v3042_v36  ;;  %v118_v30 = vld [vmem:[#allocation2 + $0x80] sm:$0xff]  ;;  %v3072_v31 = vpack.c.bf16 %v1247_v29, %v1246_v28  ;;  %v1249_v33 = vld [vmem:[#allocation8 + $0xa8] sm:$0xff]  ;;  %v121_v47 = vld [vmem:[#allocation2 + $0x98] sm:$0xff] }
  0x87   :  { %3044 = vmatprep.subr.bf16.mxu1 %v3310_v46  ;;  %v1248_v32 = vld [vmem:[#allocation8 + $0xa0] sm:$0xff]  ;;  %v1254_v48 = vld [vmem:[#allocation8 + $0xd0] sm:$0xff]  ;;  %v193_v25 = vshrl.u32 %v192_v24, 7 }
  0x88   :  { %v3075_v35 = vpack.c.bf16 %v1249_v33, %v1248_v32  ;;  %v119_v36 = vld [vmem:[#allocation2 + $0x88] sm:$0xff]  ;;  %v122_v52 = vld [vmem:[#allocation2 + $0xa0] sm:$0xff]  ;;  %v164_v53 = vld [vmem:[#allocation2 + $0x1f0] sm:$0xff] }
  0x89   :  { %2579 = vmatmul.mubr.msk.f32.vlgmr.msra.gmra.mrb[0].mxu0 %vm202_vm0, %v102_v37  ;;  %2627 = vmatmul.mubr.msk.f32.vlgmr.msra.gmra.mrb[0].mxu1 %vm202_vm0, %v150_v44  ;;  %v1250_v37 = vld [vmem:[#allocation8 + $0xb0] sm:$0xff]  ;;  %v162_v44 = vld [vmem:[#allocation2 + $0x1e0] sm:$0xff]  ;;  %v131_v5 = vld [vmem:[#allocation2 + $0xe8] sm:$0xff]  ;;  %v198_v28 = vsub.s32 1, %v193_v25 }
  0x8a   :  { %465 = vmatprep.mubr.f32.mxu0 %v3309_v0  ;;  %753 = vmatprep.mubr.f32.mxu1 %v3309_v0  ;;  %v165_v58 = vld [vmem:[#allocation2 + $0x1f8] sm:$0xff]  ;;  %v130_v4 = vld [vmem:[#allocation2 + $0xe0] sm:$0xff]  ;;  %v135_v9 = vld [vmem:[#allocation2 + $0x108] sm:$0xff] }
  0x8b   :  { %3046 = vmatpush1.bf16.msra.mxu1 %v3045_v49  ;;  %v1255_v49 = vld [vmem:[#allocation8 + $0xd8] sm:$0xff]  ;;  %v136_v10 = vld [vmem:[#allocation2 + $0x110] sm:$0xff] }
  0x8c   :  { %3047 = vmatprep.subr.bf16.mxu1 %v3310_v46  ;;  %v125_v63 = vld [vmem:[#allocation2 + $0xb8] sm:$0xff]  ;;  %v140_v14 = vld [vmem:[#allocation2 + $0x130] sm:$0xff]  ;;  %v146_v20 = vld [vmem:[#allocation2 + $0x160] sm:$0xff] }
  0x8d   :  { %2580 = vmatmul.mubr.msk.f32.gmra.mrb[2].mxu0 %vm202_vm0, %v103_v38  ;;  %2628 = vmatmul.mubr.msk.f32.gmra.mrb[2].mxu1 %vm202_vm0, %v151_v50  ;;  %v1251_v38 = vld [vmem:[#allocation8 + $0xb8] sm:$0xff]  ;;  %v163_v50 = vld [vmem:[#allocation2 + $0x1e8] sm:$0xff] }
  0x8e   :  { %471 = vmatprep.mubr.f32.mxu0 %v3309_v0  ;;  %759 = vmatprep.mubr.f32.mxu1 %v3309_v0  ;;  %v141_v15 = vld [vmem:[#allocation2 + $0x138] sm:$0xff] }
  0x8f   :  { %3049 = vmatpush1.bf16.msra.mxu1 %v3048_v54  ;;  %v123_v54 = vld [vmem:[#allocation2 + $0xa8] sm:$0xff]  ;;  %v145_v19 = vld [vmem:[#allocation2 + $0x158] sm:$0xff] }
  0x90   :  { %3050 = vmatprep.subr.bf16.mxu1 %v3310_v46 }
  0x91   :  { %2581 = vmatmul.mubr.msk.f32.gmra.mrb[4].mxu0 %vm202_vm0, %v104_v39  ;;  %2629 = vmatmul.mubr.msk.f32.gmra.mrb[4].mxu1 %vm202_vm0, %v152_v55  ;;  %v161_v39 = vld [vmem:[#allocation2 + $0x1d8] sm:$0xff]  ;;  %v1256_v55 = vld [vmem:[#allocation8 + $0xe0] sm:$0xff] }
  0x92   :  { %477 = vmatprep.mubr.f32.mxu0 %v3309_v0  ;;  %765 = vmatprep.mubr.f32.mxu1 %v3309_v0 }
  0x93   :  { %3052 = vmatpush1.bf16.msra.mxu1 %v3051_v59  ;;  %v124_v59 = vld [vmem:[#allocation2 + $0xb0] sm:$0xff] }
  0x94   :  { %3053 = vmatprep.subr.bf16.mxu1 %v3310_v46 }
  0x95   :  { %2582 = vmatmul.mubr.msk.f32.gmra.mrb[6].mxu0 %vm202_vm0, %v105_v40  ;;  %2630 = vmatmul.mubr.msk.f32.gmra.mrb[6].mxu1 %vm202_vm0, %v153_v60  ;;  %v3078_v40 = vpack.c.bf16 %v1251_v38, %v1250_v37  ;;  %v1258_v60 = vld [vmem:[#allocation8 + $0xf0] sm:$0xff] }
  0x96   :  { %483 = vmatprep.mubr.f32.mxu0 %v3309_v0  ;;  %771 = vmatprep.mubr.f32.mxu1 %v3309_v0 }
  0x97   :  { %3055 = vmatpush1.bf16.msra.mxu1 %v3054_v1  ;;  %v126_v1 = vld [vmem:[#allocation2 + $0xc0] sm:$0xff] }
  0x98   :  { %3056 = vmatprep.subr.bf16.mxu1 %v3310_v46 }
  0x99   :  { %2583 = vmatmul.mubr.msk.f32.gmra.mrb[8].mxu0 %vm202_vm0, %v106_v41  ;;  %2631 = vmatmul.mubr.msk.f32.gmra.mrb[8].mxu1 %vm202_vm0, %v154_v2  ;;  %v120_v41 = vld [vmem:[#allocation2 + $0x90] sm:$0xff]  ;;  %v127_v2 = vld [vmem:[#allocation2 + $0xc8] sm:$0xff] }
  0x9a   :  { %489 = vmatprep.mubr.f32.mxu0 %v3309_v0  ;;  %777 = vmatprep.mubr.f32.mxu1 %v3309_v0 }
  0x9b   :  { %3058 = vmatpush1.bf16.msra.mxu1 %v3057_v6  ;;  %v132_v6 = vld [vmem:[#allocation2 + $0xf0] sm:$0xff] }
  0x9c   :  { %3059 = vmatprep.subr.bf16.mxu1 %v3310_v46 }
  0x9d   :  { %2584 = vmatmul.mubr.msk.f32.gmra.mrb[10].mxu0 %vm202_vm0, %v107_v42  ;;  %2632 = vmatmul.mubr.msk.f32.gmra.mrb[10].mxu1 %vm202_vm0, %v155_v7  ;;  %v1252_v42 = vld [vmem:[#allocation8 + $0xc0] sm:$0xff]  ;;  %v133_v7 = vld [vmem:[#allocation2 + $0xf8] sm:$0xff] }
  0x9e   :  { %495 = vmatprep.mubr.f32.mxu0 %v3309_v0  ;;  %783 = vmatprep.mubr.f32.mxu1 %v3309_v0 }
  0x9f   :  { %3061 = vmatpush1.bf16.msra.mxu1 %v3060_v11  ;;  %v137_v11 = vld [vmem:[#allocation2 + $0x118] sm:$0xff] }
  0xa0   :  { %3062 = vmatprep.subr.bf16.mxu1 %v3310_v46 }
  0xa1   :  { %2585 = vmatmul.mubr.msk.f32.gmra.mrb[12].mxu0 %vm202_vm0, %v108_v43  ;;  %2633 = vmatmul.mubr.msk.f32.gmra.mrb[12].mxu1 %vm202_vm0, %v156_v12  ;;  %v1253_v43 = vld [vmem:[#allocation8 + $0xc8] sm:$0xff]  ;;  %v138_v12 = vld [vmem:[#allocation2 + $0x120] sm:$0xff] }
  0xa2   :  { %501 = vmatprep.mubr.f32.mxu0 %v3309_v0  ;;  %789 = vmatprep.mubr.f32.mxu1 %v3309_v0 }
  0xa3   :  { %3064 = vmatpush1.bf16.msra.mxu1 %v3063_v16  ;;  %v142_v16 = vld [vmem:[#allocation2 + $0x140] sm:$0xff] }
  0xa4   :  { %3065 = vmatprep.subr.bf16.mxu1 %v3310_v46 }
  0xa5   :  { %2586 = vmatmul.mubr.msk.f32.gmra.mrb[14].mxu0 %vm202_vm0, %v109_v45  ;;  %2634 = vmatmul.mubr.msk.f32.gmra.mrb[14].mxu1 %vm202_vm0, %v157_v17  ;;  %v3081_v45 = vpack.c.bf16 %v1253_v43, %v1252_v42  ;;  %v143_v17 = vld [vmem:[#allocation2 + $0x148] sm:$0xff] }
  0xa6   :  { %507 = vmatprep.mubr.f32.mxu0 %v3309_v0  ;;  %795 = vmatprep.mubr.f32.mxu1 %v3309_v0 }
  0xa7   :  { %3067 = vmatpush1.bf16.msra.mxu1 %v3066_v21  ;;  %v147_v21 = vld [vmem:[#allocation2 + $0x168] sm:$0xff] }
  0xa8   :  { %3068 = vmatprep.subr.bf16.mxu1 %v3310_v46 }
  0xa9   :  { %2587 = vmatmul.mubr.msk.f32.gmra.mrb[16].mxu0 %vm202_vm0, %v110_v51  ;;  %2635 = vmatmul.mubr.msk.f32.gmra.mrb[16].mxu1 %vm202_vm0, %v158_v22  ;;  %v3084_v51 = vpack.c.bf16 %v1255_v49, %v1254_v48  ;;  %v148_v22 = vld [vmem:[#allocation2 + $0x170] sm:$0xff] }
  0xaa   :  { %513 = vmatprep.mubr.f32.mxu0 %v3309_v0  ;;  %801 = vmatprep.mubr.f32.mxu1 %v3309_v0 }
  0xab   :  { %3070 = vmatpush1.bf16.msra.mxu1 %v3069_v26  ;;  %v194_v26 = vsub.s32 0, %v193_v25 }
  0xac   :  { %3071 = vmatprep.subr.bf16.mxu1 %v3310_v46 }
  0xad   :  { %2588 = vmatmul.mubr.msk.f32.gmra.mrb[18].mxu0 %vm202_vm0, %v111_v56  ;;  %2636 = vmatmul.mubr.msk.f32.gmra.mrb[18].mxu1 %vm202_vm0, %v159_v27  ;;  %v1257_v56 = vld [vmem:[#allocation8 + $0xe8] sm:$0xff]  ;;  %v190_v27 = vld [vmem:[#allocation7] sm:$0x3] }
  0xae   :  { %519 = vmatprep.mubr.f32.mxu0 %v3309_v0  ;;  %807 = vmatprep.mubr.f32.mxu1 %v3309_v0  ;;  %v3087_v57 = vpack.c.bf16 %v1257_v56, %v1256_v55  ;;  %v3574_v29 = vrot.slane %v190_v27, %v194_v26 }
  0xaf   :  { %3073 = vmatpush1.bf16.msra.mxu1 %v3072_v31 }
  0xb0   :  { %3074 = vmatprep.subr.bf16.mxu1 %v3310_v46 }
  0xb1   :  { %2589 = vmatmul.mubr.msk.f32.gmra.mrb[20].mxu0 %vm202_vm0, %v112_v61  ;;  %2637 = vmatmul.mubr.msk.f32.gmra.mrb[20].mxu1 %vm202_vm0, %v160_v34  ;;  %v1259_v61 = vld [vmem:[#allocation8 + $0xf8] sm:$0xff] }
  0xb2   :  { %525 = vmatprep.mubr.f32.mxu0 %v3309_v0  ;;  %813 = vmatprep.mubr.f32.mxu1 %v3309_v0  ;;  %v3090_v62 = vpack.c.bf16 %v1259_v61, %v1258_v60 }
  0xb3   :  { %3076 = vmatpush1.bf16.msra.mxu1 %v3075_v35 }
  0xb4   :  { %3077 = vmatprep.subr.bf16.mxu1 %v3310_v46 }
  0xb5   :  { %2590 = vmatmul.mubr.msk.f32.gmra.mrb[22].mxu0 %vm202_vm0, %v113_v3  ;;  %2638 = vmatmul.mubr.msk.f32.gmra.mrb[22].mxu1 %vm202_vm0, %v161_v39  ;;  %v129_v3 = vld [vmem:[#allocation2 + $0xd8] sm:$0xff] }
  0xb6   :  { %531 = vmatprep.mubr.f32.mxu0 %v3309_v0  ;;  %819 = vmatprep.mubr.f32.mxu1 %v3309_v0 }
  0xb7   :  { %3079 = vmatpush1.bf16.msra.mxu1 %v3078_v40 }
  0xb8   :  { %3080 = vmatprep.subr.bf16.mxu1 %v3310_v46 }
  0xb9   :  { %2591 = vmatmul.mubr.msk.f32.gmra.mrb[24].mxu0 %vm202_vm0, %v114_v8  ;;  %2639 = vmatmul.mubr.msk.f32.gmra.mrb[24].mxu1 %vm202_vm0, %v162_v44  ;;  %v134_v8 = vld [vmem:[#allocation2 + $0x100] sm:$0xff] }
  0xba   :  { %537 = vmatprep.mubr.f32.mxu0 %v3309_v0  ;;  %825 = vmatprep.mubr.f32.mxu1 %v3309_v0 }
  0xbb   :  { %3082 = vmatpush1.bf16.msra.mxu1 %v3081_v45 }
  0xbc   :  { %3083 = vmatprep.subr.bf16.mxu1 %v3310_v46 }
  0xbd   :  { %2592 = vmatmul.mubr.msk.f32.gmra.mrb[26].mxu0 %vm202_vm0, %v115_v13  ;;  %2640 = vmatmul.mubr.msk.f32.gmra.mrb[26].mxu1 %vm202_vm0, %v163_v50  ;;  %v139_v13 = vld [vmem:[#allocation2 + $0x128] sm:$0xff] }
  0xbe   :  { %543 = vmatprep.mubr.f32.mxu0 %v3309_v0  ;;  %831 = vmatprep.mubr.f32.mxu1 %v3309_v0 }
  0xbf   :  { %3085 = vmatpush1.bf16.msra.mxu1 %v3084_v51 }
  0xc0   :  { %3086 = vmatprep.subr.bf16.mxu1 %v3310_v46 }
  0xc1   :  { %2593 = vmatmul.mubr.msk.f32.gmra.mrb[28].mxu0 %vm202_vm0, %v116_v18  ;;  %2641 = vmatmul.mubr.msk.f32.gmra.mrb[28].mxu1 %vm202_vm0, %v164_v53  ;;  %v144_v18 = vld [vmem:[#allocation2 + $0x150] sm:$0xff] }
  0xc2   :  { %549 = vmatprep.mubr.f32.mxu0 %v3309_v0  ;;  %837 = vmatprep.mubr.f32.mxu1 %v3309_v0 }
  0xc3   :  { %3088 = vmatpush1.bf16.msra.mxu1 %v3087_v57 }
  0xc4   :  { %3089 = vmatprep.subr.bf16.mxu1 %v3310_v46  ;;  %v128_v46 = vld [vmem:[#allocation2 + $0xd0] sm:$0xff] }
  0xc5   :  { %2594 = vmatmul.mubr.msk.f32.gmra.mrb[30].mxu0 %vm202_vm0, %v117_v23  ;;  %2642 = vmatmul.mubr.msk.f32.gmra.mrb[30].mxu1 %vm202_vm0, %v165_v58  ;;  %v149_v23 = vld [vmem:[#allocation2 + $0x178] sm:$0xff] }
  0xc6   :  { %555 = vmatprep.mubr.f32.mxu0 %v3309_v0 }
  0xc7   :  { %3091 = vmatpush1.bf16.msra.mxu1 %v3090_v62 }
  0xc9   :  { %2595 = vmatmul.mubr.msk.f32.gmra.mrb[32].mxu0 %vm202_vm0, %v118_v30  ;;  %v3576_v30 = vrot.slane %v190_v27, %v198_v28 }
  0xca   :  { %561 = vmatprep.mubr.f32.mxu0 %v3309_v0 }
  0xcd   :  { %2596 = vmatmul.mubr.msk.f32.gmra.mrb[34].mxu0 %vm202_vm0, %v119_v36 }
  0xce   :  { %567 = vmatprep.mubr.f32.mxu0 %v3309_v0 }
  0xd1   :  { %2597 = vmatmul.mubr.msk.f32.gmra.mrb[36].mxu0 %vm202_vm0, %v120_v41 }
  0xd2   :  { %573 = vmatprep.mubr.f32.mxu0 %v3309_v0 }
  0xd5   :  { %2598 = vmatmul.mubr.msk.f32.gmra.mrb[38].mxu0 %vm202_vm0, %v121_v47 }
  0xd6   :  { %579 = vmatprep.mubr.f32.mxu0 %v3309_v0 }
  0xd9   :  { %2599 = vmatmul.mubr.msk.f32.gmra.mrb[40].mxu0 %vm202_vm0, %v122_v52 }
  0xda   :  { %585 = vmatprep.mubr.f32.mxu0 %v3309_v0 }
  0xdd   :  { %2600 = vmatmul.mubr.msk.f32.gmra.mrb[42].mxu0 %vm202_vm0, %v123_v54 }
  0xde   :  { %591 = vmatprep.mubr.f32.mxu0 %v3309_v0 }
  0xe1   :  { %2601 = vmatmul.mubr.msk.f32.gmra.mrb[44].mxu0 %vm202_vm0, %v124_v59 }
  0xe2   :  { %597 = vmatprep.mubr.f32.mxu0 %v3309_v0 }
  0xe5   :  { %2602 = vmatmul.mubr.msk.f32.gmra.mrb[46].mxu0 %vm202_vm0, %v125_v63 }
  0xe6   :  { %603 = vmatprep.mubr.f32.mxu0 %v3309_v0 }
  0xe9   :  { %2603 = vmatmul.mubr.msk.f32.gmra.mrb[48].mxu0 %vm202_vm0, %v126_v1 }
  0xea   :  { %609 = vmatprep.mubr.f32.mxu0 %v3309_v0 }
  0xed   :  { %2604 = vmatmul.mubr.msk.f32.gmra.mrb[50].mxu0 %vm202_vm0, %v127_v2 }
  0xee   :  { %615 = vmatprep.mubr.f32.mxu0 %v3309_v0 }
  0xf1   :  { %2605 = vmatmul.mubr.msk.f32.gmra.mrb[52].mxu0 %vm202_vm0, %v128_v46 }
  0xf2   :  { %621 = vmatprep.mubr.f32.mxu0 %v3309_v0 }
  0xf5   :  { %2606 = vmatmul.mubr.msk.f32.gmra.mrb[54].mxu0 %vm202_vm0, %v129_v3 }
  0xf6   :  { %627 = vmatprep.mubr.f32.mxu0 %v3309_v0 }
  0xf9   :  { %2607 = vmatmul.mubr.msk.f32.gmra.mrb[56].mxu0 %vm202_vm0, %v130_v4 }
  0xfa   :  { %633 = vmatprep.mubr.f32.mxu0 %v3309_v0 }
  0xfd   :  { %2608 = vmatmul.mubr.msk.f32.gmra.mrb[58].mxu0 %vm202_vm0, %v131_v5 }
  0xfe   :  { %639 = vmatprep.mubr.f32.mxu0 %v3309_v0 }
 0x101   :  { %2609 = vmatmul.mubr.msk.f32.gmra.mrb[60].mxu0 %vm202_vm0, %v132_v6 }
 0x102   :  { %645 = vmatprep.mubr.f32.mxu0 %v3309_v0 }
 0x105   :  { %2610 = vmatmul.mubr.msk.f32.gmra.mrb[62].mxu0 %vm202_vm0, %v133_v7 }
 0x106   :  { %651 = vmatprep.mubr.f32.mxu0 %v3309_v0 }
 0x109   :  { %2611 = vmatmul.mubr.msk.f32.gmra.mrb[64].mxu0 %vm202_vm0, %v134_v8 }
 0x10a   :  { %657 = vmatprep.mubr.f32.mxu0 %v3309_v0 }
 0x10d   :  { %2612 = vmatmul.mubr.msk.f32.gmra.mrb[66].mxu0 %vm202_vm0, %v135_v9 }
 0x10e   :  { %663 = vmatprep.mubr.f32.mxu0 %v3309_v0 }
 0x111   :  { %2613 = vmatmul.mubr.msk.f32.gmra.mrb[68].mxu0 %vm202_vm0, %v136_v10 }
 0x112   :  { %669 = vmatprep.mubr.f32.mxu0 %v3309_v0 }
 0x115   :  { %2614 = vmatmul.mubr.msk.f32.gmra.mrb[70].mxu0 %vm202_vm0, %v137_v11 }
 0x116   :  { %675 = vmatprep.mubr.f32.mxu0 %v3309_v0 }
 0x119   :  { %2615 = vmatmul.mubr.msk.f32.gmra.mrb[72].mxu0 %vm202_vm0, %v138_v12 }
 0x11a   :  { %681 = vmatprep.mubr.f32.mxu0 %v3309_v0 }
 0x11d   :  { %2616 = vmatmul.mubr.msk.f32.gmra.mrb[74].mxu0 %vm202_vm0, %v139_v13 }
 0x11e   :  { %687 = vmatprep.mubr.f32.mxu0 %v3309_v0 }
 0x121   :  { %2617 = vmatmul.mubr.msk.f32.gmra.mrb[76].mxu0 %vm202_vm0, %v140_v14 }
 0x122   :  { %693 = vmatprep.mubr.f32.mxu0 %v3309_v0 }
 0x125   :  { %2618 = vmatmul.mubr.msk.f32.gmra.mrb[78].mxu0 %vm202_vm0, %v141_v15 }
 0x126   :  { %699 = vmatprep.mubr.f32.mxu0 %v3309_v0 }
 0x129   :  { %2619 = vmatmul.mubr.msk.f32.gmra.mrb[80].mxu0 %vm202_vm0, %v142_v16 }
 0x12a   :  { %705 = vmatprep.mubr.f32.mxu0 %v3309_v0 }
 0x12d   :  { %2620 = vmatmul.mubr.msk.f32.gmra.mrb[82].mxu0 %vm202_vm0, %v143_v17 }
 0x12e   :  { %711 = vmatprep.mubr.f32.mxu0 %v3309_v0 }
 0x131   :  { %2621 = vmatmul.mubr.msk.f32.gmra.mrb[84].mxu0 %vm202_vm0, %v144_v18 }
 0x132   :  { %717 = vmatprep.mubr.f32.mxu0 %v3309_v0 }
 0x135   :  { %2622 = vmatmul.mubr.msk.f32.gmra.mrb[86].mxu0 %vm202_vm0, %v145_v19 }
 0x136   :  { %723 = vmatprep.mubr.f32.mxu0 %v3309_v0 }
 0x139   :  { %2623 = vmatmul.mubr.msk.f32.gmra.mrb[88].mxu0 %vm202_vm0, %v146_v20 }
 0x13a   :  { %729 = vmatprep.mubr.f32.mxu0 %v3309_v0 }
 0x13d   :  { %2624 = vmatmul.mubr.msk.f32.gmra.mrb[90].mxu0 %vm202_vm0, %v147_v21 }
 0x13e   :  { %735 = vmatprep.mubr.f32.mxu0 %v3309_v0 }
 0x141   :  { %2625 = vmatmul.mubr.msk.f32.gmra.mrb[92].mxu0 %vm202_vm0, %v148_v22 }
 0x142   :  { %741 = vmatprep.mubr.f32.mxu0 %v3309_v0 }
 0x145   :  { %2626 = vmatmul.mubr.msk.f32.gmra.mrb[94].mxu0 %vm202_vm0, %v149_v23 }
 0x15c   :  { %v461_v31 = vpop.f32.mrb[0].mxu0  ;;  %v3590_v14 = vpop.f32.mrb[0].mxu1 }
 0x15d   :  { %v462_v32 = vadd.f32 %v461_v31, %v3574_v29  ;;  %v463_v33 = vpop.f32.mrb[1].mxu0  ;;  %v3593_v17 = vpop.f32.mrb[1].mxu1 }
 0x15e   :  { %v464_v34 = vadd.f32 %v463_v33, %v3576_v30 }
 0x15f   :  { %v972_v35 = vmul.f32 0.01, %v462_v32  ;;  %vm844_vm1 = vcmp.ge.f32.partialorder %v462_v32, 0.0 }
 0x160   :  { %v973_v0 = vmul.f32 0.01, %v464_v34  ;;  %v467_v36 = vpop.f32.mrb[2].mxu0  ;;  %vm845_vm2 = vcmp.ge.f32.partialorder %v464_v34, 0.0  ;;  %v3597_v26 = vpop.f32.mrb[2].mxu1 }
 0x161   :  { %v468_v37 = vadd.f32 %v467_v36, %v3574_v29  ;;  %v469_v38 = vpop.f32.mrb[3].mxu0  ;;  %v1100_v41 = vsel %vm844_vm1, %v462_v32, %v972_v35  ;;  %v3600_v31 = vpop.f32.mrb[3].mxu1 }
 0x162   :  { %v470_v39 = vadd.f32 %v469_v38, %v3576_v30  ;;  %v1101_v40 = vsel %vm845_vm2, %v464_v34, %v973_v0  ;;  %v1653_v38 = vld [vmem:[#allocation11 + $0x8] sm:$0xff] }
 0x163   :  { %v974_v42 = vmul.f32 0.01, %v468_v37  ;;  %1331 = vmatprep.mubr.f32.mxu1 %v1101_v40  ;;  %vm846_vm4 = vcmp.ge.f32.partialorder %v468_v37, 0.0 }
 0x164   :  { %v975_v43 = vmul.f32 0.01, %v470_v39  ;;  %v473_v44 = vpop.f32.mrb[4].mxu0  ;;  %1332 = vmatmul.mubr.f32.vlgmr.msra.gmra.mrb[32].mxu1 %v1100_v41  ;;  %vm847_vm3 = vcmp.ge.f32.partialorder %v470_v39, 0.0 }
 0x165   :  { %v474_v45 = vadd.f32 %v473_v44, %v3574_v29  ;;  %v475_v47 = vpop.f32.mrb[5].mxu0  ;;  %v1102_v51 = vsel %vm846_vm4, %v468_v37, %v974_v42  ;;  %v1652_v37 = vld [vmem:[#allocation11] sm:$0xff] }
 0x166   :  { %v476_v48 = vadd.f32 %v475_v47, %v3576_v30  ;;  %v1103_v49 = vsel %vm847_vm3, %v470_v39, %v975_v43  ;;  %v3603_v39 = vpop.f32.mrb[4].mxu1  ;;  %v3092_v42 = vpack.c.bf16 %v1653_v38, %v1652_v37 }
 0x167   :  { %v976_v50 = vmul.f32 0.01, %v474_v45  ;;  %1336 = vmatprep.mubr.f32.mxu1 %v1103_v49  ;;  %vm848_vm6 = vcmp.ge.f32.partialorder %v474_v45, 0.0  ;;  %v3606_v43 = vpop.f32.mrb[5].mxu1 }
 0x168   :  { %v977_v52 = vmul.f32 0.01, %v476_v48  ;;  %v479_v53 = vpop.f32.mrb[6].mxu0  ;;  %1337 = vmatmul.mubr.f32.gmra.mrb[34].mxu1 %v1102_v51  ;;  %vm849_vm5 = vcmp.ge.f32.partialorder %v476_v48, 0.0  ;;  %3093 = vmatprep.subr.bf16.mxu0 %v3092_v42  ;;  %v3609_v51 = vpop.f32.mrb[6].mxu1 }
 0x169   :  { %v480_v54 = vadd.f32 %v479_v53, %v3574_v29  ;;  %v481_v55 = vpop.f32.mrb[7].mxu0  ;;  %v1104_v59 = vsel %vm848_vm6, %v474_v45, %v976_v50  ;;  %3095 = vmatpush3.bf16.msra.mxu0 %v3092_v42 }
 0x16a   :  { %v482_v56 = vadd.f32 %v481_v55, %v3576_v30  ;;  %v1105_v57 = vsel %vm849_vm5, %v476_v48, %v977_v52 }
 0x16b   :  { %v978_v58 = vmul.f32 0.01, %v480_v54  ;;  %1341 = vmatprep.mubr.f32.mxu1 %v1105_v57  ;;  %vm850_vm8 = vcmp.ge.f32.partialorder %v480_v54, 0.0 }
 0x16c   :  { %v979_v60 = vmul.f32 0.01, %v482_v56  ;;  %v485_v61 = vpop.f32.mrb[8].mxu0  ;;  %1342 = vmatmul.mubr.f32.gmra.mrb[36].mxu1 %v1104_v59  ;;  %vm851_vm7 = vcmp.ge.f32.partialorder %v482_v56, 0.0 }
 0x16d   :  { %v486_v62 = vadd.f32 %v485_v61, %v3574_v29  ;;  %v487_v63 = vpop.f32.mrb[9].mxu0  ;;  %v1106_v3 = vsel %vm850_vm8, %v480_v54, %v978_v58  ;;  %v3612_v54 = vpop.f32.mrb[7].mxu1 }
 0x16e   :  { %v488_v1 = vadd.f32 %v487_v63, %v3576_v30  ;;  %v1107_v2 = vsel %vm851_vm7, %v482_v56, %v979_v60  ;;  %v3615_v61 = vpop.f32.mrb[8].mxu1 }
 0x16f   :  { %v980_v46 = vmul.f32 0.01, %v486_v62  ;;  %1346 = vmatprep.mubr.f32.mxu1 %v1107_v2  ;;  %vm852_vm10 = vcmp.ge.f32.partialorder %v486_v62, 0.0 }
 0x170   :  { %v981_v4 = vmul.f32 0.01, %v488_v1  ;;  %v491_v5 = vpop.f32.mrb[10].mxu0  ;;  %1347 = vmatmul.mubr.f32.gmra.mrb[38].mxu1 %v1106_v3  ;;  %vm853_vm9 = vcmp.ge.f32.partialorder %v488_v1, 0.0 }
 0x171   :  { %v492_v6 = vadd.f32 %v491_v5, %v3574_v29  ;;  %v493_v7 = vpop.f32.mrb[11].mxu0  ;;  %v1108_v11 = vsel %vm852_vm10, %v486_v62, %v980_v46 }
 0x172   :  { %v494_v8 = vadd.f32 %v493_v7, %v3576_v30  ;;  %v1109_v9 = vsel %vm853_vm9, %v488_v1, %v981_v4  ;;  %v3618_v1 = vpop.f32.mrb[9].mxu1 }
 0x173   :  { %v982_v10 = vmul.f32 0.01, %v492_v6  ;;  %1351 = vmatprep.mubr.f32.mxu1 %v1109_v9  ;;  %vm854_vm12 = vcmp.ge.f32.partialorder %v492_v6, 0.0  ;;  %v3621_v7 = vpop.f32.mrb[10].mxu1 }
 0x174   :  { %v983_v12 = vmul.f32 0.01, %v494_v8  ;;  %v497_v13 = vpop.f32.mrb[12].mxu0  ;;  %1352 = vmatmul.mubr.f32.gmra.mrb[40].mxu1 %v1108_v11  ;;  %vm855_vm11 = vcmp.ge.f32.partialorder %v494_v8, 0.0 }
 0x175   :  { %v498_v15 = vadd.f32 %v497_v13, %v3574_v29  ;;  %v499_v16 = vpop.f32.mrb[13].mxu0  ;;  %v1110_v21 = vsel %vm854_vm12, %v492_v6, %v982_v10  ;;  %v3624_v10 = vpop.f32.mrb[11].mxu1 }
 0x176   :  { %v500_v18 = vadd.f32 %v499_v16, %v3576_v30  ;;  %v1111_v19 = vsel %vm855_vm11, %v494_v8, %v983_v12 }
 0x177   :  { %v984_v20 = vmul.f32 0.01, %v498_v15  ;;  %1356 = vmatprep.mubr.f32.mxu1 %v1111_v19  ;;  %vm856_vm14 = vcmp.ge.f32.partialorder %v498_v15, 0.0  ;;  %v3627_v19 = vpop.f32.mrb[12].mxu1 }
 0x178   :  { %v985_v22 = vmul.f32 0.01, %v500_v18  ;;  %v503_v23 = vpop.f32.mrb[14].mxu0  ;;  %1357 = vmatmul.mubr.f32.gmra.mrb[42].mxu1 %v1110_v21  ;;  %vm857_vm13 = vcmp.ge.f32.partialorder %v500_v18, 0.0 }
 0x179   :  { %v504_v24 = vadd.f32 %v503_v23, %v3574_v29  ;;  %v505_v25 = vpop.f32.mrb[15].mxu0  ;;  %v1112_v33 = vsel %vm856_vm14, %v498_v15, %v984_v20 }
 0x17a   :  { %v506_v27 = vadd.f32 %v505_v25, %v3576_v30  ;;  %v1113_v28 = vsel %vm857_vm13, %v500_v18, %v985_v22  ;;  %v3630_v22 = vpop.f32.mrb[13].mxu1 }
 0x17b   :  { %v986_v32 = vmul.f32 0.01, %v504_v24  ;;  %1361 = vmatprep.mubr.f32.mxu1 %v1113_v28  ;;  %vm858_vm0 = vcmp.ge.f32.partialorder %v504_v24, 0.0 }
 0x17c   :  { %v987_v34 = vmul.f32 0.01, %v506_v27  ;;  %v509_v35 = vpop.f32.mrb[16].mxu0  ;;  %1362 = vmatmul.mubr.f32.gmra.mrb[44].mxu1 %v1112_v33  ;;  %vm859_vm15 = vcmp.ge.f32.partialorder %v506_v27, 0.0  ;;  %v3633_v33 = vpop.f32.mrb[14].mxu1 }
 0x17d   :  { %v510_v0 = vadd.f32 %v509_v35, %v3574_v29  ;;  %v511_v36 = vpop.f32.mrb[17].mxu0  ;;  %v1114_v45 = vsel %vm858_vm0, %v504_v24, %v986_v32 }
 0x17e   :  { %v512_v40 = vadd.f32 %v511_v36, %v3576_v30  ;;  %v1115_v41 = vsel %vm859_vm15, %v506_v27, %v987_v34 }
 0x17f   :  { %v988_v44 = vmul.f32 0.01, %v510_v0  ;;  %1366 = vmatprep.mubr.f32.mxu1 %v1115_v41  ;;  %vm860_vm2 = vcmp.ge.f32.partialorder %v510_v0, 0.0 }
 0x180   :  { %v989_v47 = vmul.f32 0.01, %v512_v40  ;;  %v515_v48 = vpop.f32.mrb[18].mxu0  ;;  %1367 = vmatmul.mubr.f32.gmra.mrb[46].mxu1 %v1114_v45  ;;  %vm861_vm1 = vcmp.ge.f32.partialorder %v512_v40, 0.0 }
 0x181   :  { %v516_v49 = vadd.f32 %v515_v48, %v3574_v29  ;;  %v517_v50 = vpop.f32.mrb[19].mxu0  ;;  %v1116_v56 = vsel %vm860_vm2, %v510_v0, %v988_v44  ;;  %v3636_v0 = vpop.f32.mrb[15].mxu1 }
 0x182   :  { %v518_v52 = vadd.f32 %v517_v50, %v3576_v30  ;;  %v1117_v53 = vsel %vm861_vm1, %v512_v40, %v989_v47  ;;  %v3639_v44 = vpop.f32.mrb[16].mxu1 }
 0x183   :  { %v990_v55 = vmul.f32 0.01, %v516_v49  ;;  %1371 = vmatprep.mubr.f32.mxu1 %v1117_v53  ;;  %vm862_vm4 = vcmp.ge.f32.partialorder %v516_v49, 0.0  ;;  %v3642_v48 = vpop.f32.mrb[17].mxu1 }
 0x184   :  { %v991_v57 = vmul.f32 0.01, %v518_v52  ;;  %v521_v58 = vpop.f32.mrb[20].mxu0  ;;  %1372 = vmatmul.mubr.f32.gmra.mrb[48].mxu1 %v1116_v56  ;;  %vm863_vm3 = vcmp.ge.f32.partialorder %v518_v52, 0.0 }
 0x185   :  { %v522_v59 = vadd.f32 %v521_v58, %v3574_v29  ;;  %v523_v60 = vpop.f32.mrb[21].mxu0  ;;  %v1118_v46 = vsel %vm862_vm4, %v516_v49, %v990_v55 }
 0x186   :  { %v524_v62 = vadd.f32 %v523_v60, %v3576_v30  ;;  %v1119_v63 = vsel %vm863_vm3, %v518_v52, %v991_v57  ;;  %v3645_v57 = vpop.f32.mrb[18].mxu1 }
 0x187   :  { %v992_v2 = vmul.f32 0.01, %v522_v59  ;;  %1376 = vmatprep.mubr.f32.mxu1 %v1119_v63  ;;  %vm864_vm6 = vcmp.ge.f32.partialorder %v522_v59, 0.0  ;;  %v3648_v60 = vpop.f32.mrb[19].mxu1 }
 0x188   :  { %v993_v3 = vmul.f32 0.01, %v524_v62  ;;  %v527_v4 = vpop.f32.mrb[22].mxu0  ;;  %1377 = vmatmul.mubr.f32.gmra.mrb[50].mxu1 %v1118_v46  ;;  %vm865_vm5 = vcmp.ge.f32.partialorder %v524_v62, 0.0 }
 0x189   :  { %v528_v5 = vadd.f32 %v527_v4, %v3574_v29  ;;  %v529_v6 = vpop.f32.mrb[23].mxu0  ;;  %v1120_v12 = vsel %vm864_vm6, %v522_v59, %v992_v2 }
 0x18a   :  { %v530_v8 = vadd.f32 %v529_v6, %v3576_v30  ;;  %v1121_v9 = vsel %vm865_vm5, %v524_v62, %v993_v3 }
 0x18b   :  { %v994_v11 = vmul.f32 0.01, %v528_v5  ;;  %1381 = vmatprep.mubr.f32.mxu1 %v1121_v9  ;;  %vm866_vm8 = vcmp.ge.f32.partialorder %v528_v5, 0.0 }
 0x18c   :  { %v995_v13 = vmul.f32 0.01, %v530_v8  ;;  %v533_v15 = vpop.f32.mrb[24].mxu0  ;;  %1382 = vmatmul.mubr.f32.gmra.mrb[52].mxu1 %v1120_v12  ;;  %vm867_vm7 = vcmp.ge.f32.partialorder %v530_v8, 0.0 }
 0x18d   :  { %v534_v16 = vadd.f32 %v533_v15, %v3574_v29  ;;  %v535_v18 = vpop.f32.mrb[25].mxu0  ;;  %v1122_v24 = vsel %vm866_vm8, %v528_v5, %v994_v11  ;;  %v3651_v5 = vpop.f32.mrb[20].mxu1 }
 0x18e   :  { %v536_v20 = vadd.f32 %v535_v18, %v3576_v30  ;;  %v1123_v21 = vsel %vm867_vm7, %v530_v8, %v995_v13  ;;  %v3654_v9 = vpop.f32.mrb[21].mxu1 }
 0x18f   :  { %v996_v23 = vmul.f32 0.01, %v534_v16  ;;  %1386 = vmatprep.mubr.f32.mxu1 %v1123_v21  ;;  %vm868_vm10 = vcmp.ge.f32.partialorder %v534_v16, 0.0 }
 0x190   :  { %v997_v25 = vmul.f32 0.01, %v536_v20  ;;  %v539_v27 = vpop.f32.mrb[26].mxu0  ;;  %1387 = vmatmul.mubr.f32.gmra.mrb[54].mxu1 %v1122_v24  ;;  %vm869_vm9 = vcmp.ge.f32.partialorder %v536_v20, 0.0 }
 0x191   :  { %v540_v28 = vadd.f32 %v539_v27, %v3574_v29  ;;  %v541_v32 = vpop.f32.mrb[27].mxu0  ;;  %v1124_v37 = vsel %vm868_vm10, %v534_v16, %v996_v23 }
 0x192   :  { %v542_v34 = vadd.f32 %v541_v32, %v3576_v30  ;;  %v1125_v35 = vsel %vm869_vm9, %v536_v20, %v997_v25  ;;  %v3657_v20 = vpop.f32.mrb[22].mxu1 }
 0x193   :  { %v998_v36 = vmul.f32 0.01, %v540_v28  ;;  %1391 = vmatprep.mubr.f32.mxu1 %v1125_v35  ;;  %vm870_vm12 = vcmp.ge.f32.partialorder %v540_v28, 0.0  ;;  %v3660_v24 = vpop.f32.mrb[23].mxu1 }
 0x194   :  { %v999_v38 = vmul.f32 0.01, %v542_v34  ;;  %v545_v40 = vpop.f32.mrb[28].mxu0  ;;  %1392 = vmatmul.mubr.f32.gmra.mrb[56].mxu1 %v1124_v37  ;;  %vm871_vm11 = vcmp.ge.f32.partialorder %v542_v34, 0.0 }
 0x195   :  { %v546_v41 = vadd.f32 %v545_v40, %v3574_v29  ;;  %v547_v42 = vpop.f32.mrb[29].mxu0  ;;  %v1126_v50 = vsel %vm870_vm12, %v540_v28, %v998_v36  ;;  %v3663_v36 = vpop.f32.mrb[24].mxu1 }
 0x196   :  { %v548_v45 = vadd.f32 %v547_v42, %v3576_v30  ;;  %v1127_v47 = vsel %vm871_vm11, %v542_v34, %v999_v38  ;;  %v3666_v40 = vpop.f32.mrb[25].mxu1 }
 0x197   :  { %v1000_v49 = vmul.f32 0.01, %v546_v41  ;;  %1396 = vmatprep.mubr.f32.mxu1 %v1127_v47  ;;  %vm872_vm14 = vcmp.ge.f32.partialorder %v546_v41, 0.0 }
 0x198   :  { %v1001_v52 = vmul.f32 0.01, %v548_v45  ;;  %v551_v53 = vpop.f32.mrb[30].mxu0  ;;  %1397 = vmatmul.mubr.f32.gmra.mrb[58].mxu1 %v1126_v50  ;;  %vm873_vm13 = vcmp.ge.f32.partialorder %v548_v45, 0.0 }
 0x199   :  { %v552_v55 = vadd.f32 %v551_v53, %v3574_v29  ;;  %v553_v56 = vpop.f32.mrb[31].mxu0  ;;  %v1128_v63 = vsel %vm872_vm14, %v546_v41, %v1000_v49  ;;  %v1654_v53 = vld [vmem:[#allocation11 + $0x10] sm:$0xff] }
 0x19a   :  { %v554_v58 = vadd.f32 %v553_v56, %v3576_v30  ;;  %v1129_v59 = vsel %vm873_vm13, %v548_v45, %v1001_v52  ;;  %v3669_v52 = vpop.f32.mrb[26].mxu1 }
 0x19b   :  { %v1002_v62 = vmul.f32 0.01, %v552_v55  ;;  %1401 = vmatprep.mubr.f32.mxu1 %v1129_v59  ;;  %vm874_vm0 = vcmp.ge.f32.partialorder %v552_v55, 0.0  ;;  %v3672_v59 = vpop.f32.mrb[27].mxu1 }
 0x19c   :  { %v1003_v2 = vmul.f32 0.01, %v554_v58  ;;  %v557_v46 = vpop.f32.mrb[32].mxu0  ;;  %1402 = vmatmul.mubr.f32.gmra.mrb[60].mxu1 %v1128_v63  ;;  %vm875_vm15 = vcmp.ge.f32.partialorder %v554_v58, 0.0 }
 0x19d   :  { %v558_v3 = vadd.f32 %v557_v46, %v3574_v29  ;;  %v559_v4 = vpop.f32.mrb[33].mxu0  ;;  %v1130_v12 = vsel %vm874_vm0, %v552_v55, %v1002_v62  ;;  %v1655_v55 = vld [vmem:[#allocation11 + $0x18] sm:$0xff] }
 0x19e   :  { %v560_v6 = vadd.f32 %v559_v4, %v3576_v30  ;;  %v1131_v8 = vsel %vm875_vm15, %v554_v58, %v1003_v2  ;;  %v3096_v62 = vpack.c.bf16 %v1655_v55, %v1654_v53 }
 0x19f   :  { %v1004_v11 = vmul.f32 0.01, %v558_v3  ;;  %1406 = vmatprep.mubr.f32.mxu1 %v1131_v8  ;;  %vm876_vm2 = vcmp.ge.f32.partialorder %v558_v3, 0.0  ;;  %v3675_v8 = vpop.f32.mrb[28].mxu1 }
 0x1a0   :  { %v1005_v13 = vmul.f32 0.01, %v560_v6  ;;  %v563_v15 = vpop.f32.mrb[34].mxu0  ;;  %1407 = vmatmul.mubr.f32.gmra.mrb[62].mxu1 %v1130_v12  ;;  %vm877_vm1 = vcmp.ge.f32.partialorder %v560_v6, 0.0  ;;  %3097 = vmatprep.subr.bf16.mxu0 %v3096_v62 }
 0x1a1   :  { %v564_v16 = vadd.f32 %v563_v15, %v3574_v29  ;;  %v565_v18 = vpop.f32.mrb[35].mxu0  ;;  %v1132_v27 = vsel %vm876_vm2, %v558_v3, %v1004_v11  ;;  %3099 = vmatpush3.bf16.msra.mxu0 %v3096_v62  ;;  %v1658_v62 = vld [vmem:[#allocation11 + $0x30] sm:$0xff] }
 0x1a2   :  { %v566_v21 = vadd.f32 %v565_v18, %v3576_v30  ;;  %v1133_v23 = vsel %vm877_vm1, %v560_v6, %v1005_v13  ;;  %v3678_v13 = vpop.f32.mrb[29].mxu1 }
 0x1a3   :  { %v1006_v25 = vmul.f32 0.01, %v564_v16  ;;  %1411 = vmatprep.mubr.f32.mxu1 %v1133_v23  ;;  %vm878_vm4 = vcmp.ge.f32.partialorder %v564_v16, 0.0 }
 0x1a4   :  { %v1007_v28 = vmul.f32 0.01, %v566_v21  ;;  %v569_v32 = vpop.f32.mrb[36].mxu0  ;;  %1412 = vmatmul.mubr.f32.gmra.mrb[64].mxu1 %v1132_v27  ;;  %vm879_vm3 = vcmp.ge.f32.partialorder %v566_v21, 0.0  ;;  %v3681_v27 = vpop.f32.mrb[30].mxu1 }
 0x1a5   :  { %v570_v34 = vadd.f32 %v569_v32, %v3574_v29  ;;  %v571_v35 = vpop.f32.mrb[37].mxu0  ;;  %v1134_v42 = vsel %vm878_vm4, %v564_v16, %v1006_v25 }
 0x1a6   :  { %v572_v37 = vadd.f32 %v571_v35, %v3576_v30  ;;  %v1135_v38 = vsel %vm879_vm3, %v566_v21, %v1007_v28 }
 0x1a7   :  { %v1008_v41 = vmul.f32 0.01, %v570_v34  ;;  %1416 = vmatprep.mubr.f32.mxu1 %v1135_v38  ;;  %vm880_vm6 = vcmp.ge.f32.partialorder %v570_v34, 0.0  ;;  %v1656_v38 = vld [vmem:[#allocation11 + $0x20] sm:$0xff] }
 0x1a8   :  { %v1009_v45 = vmul.f32 0.01, %v572_v37  ;;  %v575_v47 = vpop.f32.mrb[38].mxu0  ;;  %1417 = vmatmul.mubr.f32.gmra.mrb[66].mxu1 %v1134_v42  ;;  %vm881_vm5 = vcmp.ge.f32.partialorder %v572_v37, 0.0 }
 0x1a9   :  { %v576_v49 = vadd.f32 %v575_v47, %v3574_v29  ;;  %v577_v50 = vpop.f32.mrb[39].mxu0  ;;  %v1136_v2 = vsel %vm880_vm6, %v570_v34, %v1008_v41  ;;  %v3684_v34 = vpop.f32.mrb[31].mxu1  ;;  %v1657_v41 = vld [vmem:[#allocation11 + $0x28] sm:$0xff] }
 0x1aa   :  { %v578_v56 = vadd.f32 %v577_v50, %v3576_v30  ;;  %v1137_v58 = vsel %vm881_vm5, %v572_v37, %v1009_v45  ;;  %v3100_v47 = vpack.c.bf16 %v1657_v41, %v1656_v38 }
 0x1ab   :  { %v1010_v63 = vmul.f32 0.01, %v576_v49  ;;  %1421 = vmatprep.mubr.f32.mxu1 %v1137_v58  ;;  %vm882_vm8 = vcmp.ge.f32.partialorder %v576_v49, 0.0 }
 0x1ac   :  { %v1011_v46 = vmul.f32 0.01, %v578_v56  ;;  %v581_v3 = vpop.f32.mrb[40].mxu0  ;;  %1422 = vmatmul.mubr.f32.gmra.mrb[68].mxu1 %v1136_v2  ;;  %vm883_vm7 = vcmp.ge.f32.partialorder %v578_v56, 0.0  ;;  %3101 = vmatprep.subr.bf16.mxu0 %v3100_v47 }
 0x1ad   :  { %v582_v4 = vadd.f32 %v581_v3, %v3574_v29  ;;  %v583_v6 = vpop.f32.mrb[41].mxu0  ;;  %v1138_v16 = vsel %vm882_vm8, %v576_v49, %v1010_v63  ;;  %3103 = vmatpush3.bf16.msra.mxu0 %v3100_v47  ;;  %v1659_v63 = vld [vmem:[#allocation11 + $0x38] sm:$0xff] }
 0x1ae   :  { %v584_v11 = vadd.f32 %v583_v6, %v3576_v30  ;;  %v1139_v12 = vsel %vm883_vm7, %v578_v56, %v1011_v46  ;;  %v3104_v3 = vpack.c.bf16 %v1659_v63, %v1658_v62 }
 0x1af   :  { %v1012_v15 = vmul.f32 0.01, %v582_v4  ;;  %1426 = vmatprep.mubr.f32.mxu1 %v1139_v12  ;;  %vm884_vm10 = vcmp.ge.f32.partialorder %v582_v4, 0.0 }
 0x1b0   :  { %v1013_v18 = vmul.f32 0.01, %v584_v11  ;;  %v587_v21 = vpop.f32.mrb[42].mxu0  ;;  %1427 = vmatmul.mubr.f32.gmra.mrb[70].mxu1 %v1138_v16  ;;  %vm885_vm9 = vcmp.ge.f32.partialorder %v584_v11, 0.0  ;;  %3105 = vmatprep.subr.bf16.mxu0 %v3104_v3 }
 0x1b1   :  { %v588_v23 = vadd.f32 %v587_v21, %v3574_v29  ;;  %v589_v25 = vpop.f32.mrb[43].mxu0  ;;  %v1140_v37 = vsel %vm884_vm10, %v582_v4, %v1012_v15  ;;  %3107 = vmatpush3.bf16.msra.mxu0 %v3104_v3 }
 0x1b2   :  { %v590_v28 = vadd.f32 %v589_v25, %v3576_v30  ;;  %v1141_v32 = vsel %vm885_vm9, %v584_v11, %v1013_v18 }
 0x1b3   :  { %v1014_v35 = vmul.f32 0.01, %v588_v23  ;;  %1431 = vmatprep.mubr.f32.mxu1 %v1141_v32  ;;  %vm886_vm12 = vcmp.ge.f32.partialorder %v588_v23, 0.0 }
 0x1b4   :  { %v1015_v42 = vmul.f32 0.01, %v590_v28  ;;  %v593_v45 = vpop.f32.mrb[44].mxu0  ;;  %1432 = vmatmul.mubr.f32.gmra.mrb[72].mxu1 %v1140_v37  ;;  %vm887_vm11 = vcmp.ge.f32.partialorder %v590_v28, 0.0 }
 0x1b5   :  { %v594_v49 = vadd.f32 %v593_v45, %v3574_v29  ;;  %v595_v50 = vpop.f32.mrb[45].mxu0  ;;  %v1142_v58 = vsel %vm886_vm12, %v588_v23, %v1014_v35 }
 0x1b6   :  { %v596_v53 = vadd.f32 %v595_v50, %v3576_v30  ;;  %v1143_v55 = vsel %vm887_vm11, %v590_v28, %v1015_v42 }
 0x1b7   :  { %v1016_v56 = vmul.f32 0.01, %v594_v49  ;;  %1436 = vmatprep.mubr.f32.mxu1 %v1143_v55  ;;  %vm888_vm14 = vcmp.ge.f32.partialorder %v594_v49, 0.0 }
 0x1b8   :  { %v1017_v2 = vmul.f32 0.01, %v596_v53  ;;  %v599_v46 = vpop.f32.mrb[46].mxu0  ;;  %1437 = vmatmul.mubr.f32.gmra.mrb[74].mxu1 %v1142_v58  ;;  %vm889_vm13 = vcmp.ge.f32.partialorder %v596_v53, 0.0 }
 0x1b9   :  { %v600_v4 = vadd.f32 %v599_v46, %v3574_v29  ;;  %v601_v6 = vpop.f32.mrb[47].mxu0  ;;  %v1144_v16 = vsel %vm888_vm14, %v594_v49, %v1016_v56 }
 0x1ba   :  { %v602_v11 = vadd.f32 %v601_v6, %v3576_v30  ;;  %v1145_v12 = vsel %vm889_vm13, %v596_v53, %v1017_v2 }
 0x1bb   :  { %v1018_v15 = vmul.f32 0.01, %v600_v4  ;;  %1441 = vmatprep.mubr.f32.mxu1 %v1145_v12  ;;  %vm890_vm0 = vcmp.ge.f32.partialorder %v600_v4, 0.0 }
 0x1bc   :  { %v1019_v18 = vmul.f32 0.01, %v602_v11  ;;  %v605_v21 = vpop.f32.mrb[48].mxu0  ;;  %1442 = vmatmul.mubr.f32.gmra.mrb[76].mxu1 %v1144_v16  ;;  %vm891_vm15 = vcmp.ge.f32.partialorder %v602_v11, 0.0 }
 0x1bd   :  { %v606_v23 = vadd.f32 %v605_v21, %v3574_v29  ;;  %v607_v25 = vpop.f32.mrb[49].mxu0  ;;  %v1146_v37 = vsel %vm890_vm0, %v600_v4, %v1018_v15 }
 0x1be   :  { %v608_v28 = vadd.f32 %v607_v25, %v3576_v30  ;;  %v1147_v32 = vsel %vm891_vm15, %v602_v11, %v1019_v18 }
 0x1bf   :  { %v1020_v35 = vmul.f32 0.01, %v606_v23  ;;  %1446 = vmatprep.mubr.f32.mxu1 %v1147_v32  ;;  %vm892_vm2 = vcmp.ge.f32.partialorder %v606_v23, 0.0 }
 0x1c0   :  { %v1021_v38 = vmul.f32 0.01, %v608_v28  ;;  %v611_v41 = vpop.f32.mrb[50].mxu0  ;;  %1447 = vmatmul.mubr.f32.gmra.mrb[78].mxu1 %v1146_v37  ;;  %vm893_vm1 = vcmp.ge.f32.partialorder %v608_v28, 0.0 }
 0x1c1   :  { %v612_v42 = vadd.f32 %v611_v41, %v3574_v29  ;;  %v613_v45 = vpop.f32.mrb[51].mxu0  ;;  %v1148_v53 = vsel %vm892_vm2, %v606_v23, %v1020_v35 }
 0x1c2   :  { %v614_v47 = vadd.f32 %v613_v45, %v3576_v30  ;;  %v1149_v49 = vsel %vm893_vm1, %v608_v28, %v1021_v38 }
 0x1c3   :  { %v1022_v50 = vmul.f32 0.01, %v612_v42  ;;  %1451 = vmatprep.mubr.f32.mxu1 %v1149_v49  ;;  %vm894_vm4 = vcmp.ge.f32.partialorder %v612_v42, 0.0 }
 0x1c4   :  { %v1023_v55 = vmul.f32 0.01, %v614_v47  ;;  %v617_v56 = vpop.f32.mrb[52].mxu0  ;;  %1452 = vmatmul.mubr.f32.gmra.mrb[80].mxu1 %v1148_v53  ;;  %vm895_vm3 = vcmp.ge.f32.partialorder %v614_v47, 0.0 }
 0x1c5   :  { %v618_v58 = vadd.f32 %v617_v56, %v3574_v29  ;;  %v619_v62 = vpop.f32.mrb[53].mxu0  ;;  %v1150_v3 = vsel %vm894_vm4, %v612_v42, %v1022_v50 }
 0x1c6   :  { %v620_v63 = vadd.f32 %v619_v62, %v3576_v30  ;;  %v1151_v2 = vsel %vm895_vm3, %v614_v47, %v1023_v55 }
 0x1c7   :  { %v1024_v46 = vmul.f32 0.01, %v618_v58  ;;  %1456 = vmatprep.mubr.f32.mxu1 %v1151_v2  ;;  %vm896_vm6 = vcmp.ge.f32.partialorder %v618_v58, 0.0 }
 0x1c8   :  { %v1025_v4 = vmul.f32 0.01, %v620_v63  ;;  %v623_v6 = vpop.f32.mrb[54].mxu0  ;;  %1457 = vmatmul.mubr.f32.gmra.mrb[82].mxu1 %v1150_v3  ;;  %vm897_vm5 = vcmp.ge.f32.partialorder %v620_v63, 0.0 }
 0x1c9   :  { %v624_v11 = vadd.f32 %v623_v6, %v3574_v29  ;;  %v625_v12 = vpop.f32.mrb[55].mxu0  ;;  %v1152_v21 = vsel %vm896_vm6, %v618_v58, %v1024_v46 }
 0x1ca   :  { %v626_v15 = vadd.f32 %v625_v12, %v3576_v30  ;;  %v1153_v16 = vsel %vm897_vm5, %v620_v63, %v1025_v4 }
 0x1cb   :  { %v1026_v18 = vmul.f32 0.01, %v624_v11  ;;  %1461 = vmatprep.mubr.f32.mxu1 %v1153_v16  ;;  %vm898_vm8 = vcmp.ge.f32.partialorder %v624_v11, 0.0 }
 0x1cc   :  { %v1027_v23 = vmul.f32 0.01, %v626_v15  ;;  %v629_v25 = vpop.f32.mrb[56].mxu0  ;;  %1462 = vmatmul.mubr.f32.gmra.mrb[84].mxu1 %v1152_v21  ;;  %vm899_vm7 = vcmp.ge.f32.partialorder %v626_v15, 0.0 }
 0x1cd   :  { %v630_v28 = vadd.f32 %v629_v25, %v3574_v29  ;;  %v631_v32 = vpop.f32.mrb[57].mxu0  ;;  %v1154_v41 = vsel %vm898_vm8, %v624_v11, %v1026_v18 }
 0x1ce   :  { %v632_v35 = vadd.f32 %v631_v32, %v3576_v30  ;;  %v1155_v37 = vsel %vm899_vm7, %v626_v15, %v1027_v23 }
 0x1cf   :  { %v1028_v38 = vmul.f32 0.01, %v630_v28  ;;  %1466 = vmatprep.mubr.f32.mxu1 %v1155_v37  ;;  %vm900_vm10 = vcmp.ge.f32.partialorder %v630_v28, 0.0 }
 0x1d0   :  { %v1029_v42 = vmul.f32 0.01, %v632_v35  ;;  %v635_v45 = vpop.f32.mrb[58].mxu0  ;;  %1467 = vmatmul.mubr.f32.gmra.mrb[86].mxu1 %v1154_v41  ;;  %vm901_vm9 = vcmp.ge.f32.partialorder %v632_v35, 0.0 }
 0x1d1   :  { %v636_v47 = vadd.f32 %v635_v45, %v3574_v29  ;;  %v637_v49 = vpop.f32.mrb[59].mxu0  ;;  %v1156_v56 = vsel %vm900_vm10, %v630_v28, %v1028_v38 }
 0x1d2   :  { %v638_v50 = vadd.f32 %v637_v49, %v3576_v30  ;;  %v1157_v53 = vsel %vm901_vm9, %v632_v35, %v1029_v42 }
 0x1d3   :  { %v1030_v55 = vmul.f32 0.01, %v636_v47  ;;  %1471 = vmatprep.mubr.f32.mxu1 %v1157_v53  ;;  %vm902_vm12 = vcmp.ge.f32.partialorder %v636_v47, 0.0 }
 0x1d4   :  { %v1031_v58 = vmul.f32 0.01, %v638_v50  ;;  %v641_v62 = vpop.f32.mrb[60].mxu0  ;;  %1472 = vmatmul.mubr.f32.gmra.mrb[88].mxu1 %v1156_v56  ;;  %vm903_vm11 = vcmp.ge.f32.partialorder %v638_v50, 0.0 }
 0x1d5   :  { %v642_v63 = vadd.f32 %v641_v62, %v3574_v29  ;;  %v643_v2 = vpop.f32.mrb[61].mxu0  ;;  %v1158_v6 = vsel %vm902_vm12, %v636_v47, %v1030_v55 }
 0x1d6   :  { %v644_v46 = vadd.f32 %v643_v2, %v3576_v30  ;;  %v1159_v3 = vsel %vm903_vm11, %v638_v50, %v1031_v58 }
 0x1d7   :  { %v1032_v4 = vmul.f32 0.01, %v642_v63  ;;  %1476 = vmatprep.mubr.f32.mxu1 %v1159_v3  ;;  %vm904_vm14 = vcmp.ge.f32.partialorder %v642_v63, 0.0 }
 0x1d8   :  { %v1033_v11 = vmul.f32 0.01, %v644_v46  ;;  %v647_v12 = vpop.f32.mrb[62].mxu0  ;;  %1477 = vmatmul.mubr.f32.gmra.mrb[90].mxu1 %v1158_v6  ;;  %vm905_vm13 = vcmp.ge.f32.partialorder %v644_v46, 0.0 }
 0x1d9   :  { %v648_v15 = vadd.f32 %v647_v12, %v3574_v29  ;;  %v649_v16 = vpop.f32.mrb[63].mxu0  ;;  %v1160_v25 = vsel %vm904_vm14, %v642_v63, %v1032_v4 }
 0x1da   :  { %v650_v18 = vadd.f32 %v649_v16, %v3576_v30  ;;  %v1161_v21 = vsel %vm905_vm13, %v644_v46, %v1033_v11 }
 0x1db   :  { %v1034_v23 = vmul.f32 0.01, %v648_v15  ;;  %1481 = vmatprep.mubr.f32.mxu1 %v1161_v21  ;;  %vm906_vm0 = vcmp.ge.f32.partialorder %v648_v15, 0.0 }
 0x1dc   :  { %v1035_v28 = vmul.f32 0.01, %v650_v18  ;;  %v653_v32 = vpop.f32.mrb[64].mxu0  ;;  %1482 = vmatmul.mubr.f32.gmra.mrb[92].mxu1 %v1160_v25  ;;  %vm907_vm15 = vcmp.ge.f32.partialorder %v650_v18, 0.0 }
 0x1dd   :  { %v654_v35 = vadd.f32 %v653_v32, %v3574_v29  ;;  %v655_v37 = vpop.f32.mrb[65].mxu0  ;;  %v1162_v45 = vsel %vm906_vm0, %v648_v15, %v1034_v23 }
 0x1de   :  { %v656_v38 = vadd.f32 %v655_v37, %v3576_v30  ;;  %v1163_v41 = vsel %vm907_vm15, %v650_v18, %v1035_v28 }
 0x1df   :  { %v1036_v42 = vmul.f32 0.01, %v654_v35  ;;  %1486 = vmatprep.mubr.f32.mxu1 %v1163_v41  ;;  %vm908_vm2 = vcmp.ge.f32.partialorder %v654_v35, 0.0 }
 0x1e0   :  { %v1037_v47 = vmul.f32 0.01, %v656_v38  ;;  %v659_v49 = vpop.f32.mrb[66].mxu0  ;;  %1487 = vmatmul.mubr.f32.gmra.mrb[94].mxu1 %v1162_v45  ;;  %vm909_vm1 = vcmp.ge.f32.partialorder %v656_v38, 0.0 }
 0x1e1   :  { %v660_v50 = vadd.f32 %v659_v49, %v3574_v29  ;;  %v661_v53 = vpop.f32.mrb[67].mxu0  ;;  %v1164_v62 = vsel %vm908_vm2, %v654_v35, %v1036_v42 }
 0x1e2   :  { %v662_v55 = vadd.f32 %v661_v53, %v3576_v30  ;;  %v1165_v56 = vsel %vm909_vm1, %v656_v38, %v1037_v47 }
 0x1e3   :  { %v1038_v58 = vmul.f32 0.01, %v660_v50  ;;  %1491 = vmatprep.mubr.f32.mxu1 %v1165_v56  ;;  %vm910_vm4 = vcmp.ge.f32.partialorder %v660_v50, 0.0 }
 0x1e4   :  { %v1039_v63 = vmul.f32 0.01, %v662_v55  ;;  %v665_v2 = vpop.f32.mrb[68].mxu0  ;;  %1492 = vmatmul.mubr.f32.gmra.mrb[96].mxu1 %v1164_v62  ;;  %vm911_vm3 = vcmp.ge.f32.partialorder %v662_v55, 0.0 }
 0x1e5   :  { %v666_v46 = vadd.f32 %v665_v2, %v3574_v29  ;;  %v667_v3 = vpop.f32.mrb[69].mxu0  ;;  %v1166_v12 = vsel %vm910_vm4, %v660_v50, %v1038_v58 }
 0x1e6   :  { %v668_v4 = vadd.f32 %v667_v3, %v3576_v30  ;;  %v1167_v6 = vsel %vm911_vm3, %v662_v55, %v1039_v63 }
 0x1e7   :  { %v1040_v11 = vmul.f32 0.01, %v666_v46  ;;  %1496 = vmatprep.mubr.f32.mxu1 %v1167_v6  ;;  %vm912_vm6 = vcmp.ge.f32.partialorder %v666_v46, 0.0 }
 0x1e8   :  { %v1041_v15 = vmul.f32 0.01, %v668_v4  ;;  %v671_v16 = vpop.f32.mrb[70].mxu0  ;;  %1497 = vmatmul.mubr.f32.gmra.mrb[98].mxu1 %v1166_v12  ;;  %vm913_vm5 = vcmp.ge.f32.partialorder %v668_v4, 0.0 }
 0x1e9   :  { %v672_v18 = vadd.f32 %v671_v16, %v3574_v29  ;;  %v673_v21 = vpop.f32.mrb[71].mxu0  ;;  %v1168_v32 = vsel %vm912_vm6, %v666_v46, %v1040_v11 }
 0x1ea   :  { %v674_v23 = vadd.f32 %v673_v21, %v3576_v30  ;;  %v1169_v25 = vsel %vm913_vm5, %v668_v4, %v1041_v15 }
 0x1eb   :  { %v1042_v28 = vmul.f32 0.01, %v672_v18  ;;  %1501 = vmatprep.mubr.f32.mxu1 %v1169_v25  ;;  %vm914_vm8 = vcmp.ge.f32.partialorder %v672_v18, 0.0 }
 0x1ec   :  { %v1043_v35 = vmul.f32 0.01, %v674_v23  ;;  %v677_v37 = vpop.f32.mrb[72].mxu0  ;;  %1502 = vmatmul.mubr.f32.gmra.mrb[100].mxu1 %v1168_v32  ;;  %vm915_vm7 = vcmp.ge.f32.partialorder %v674_v23, 0.0 }
 0x1ed   :  { %v678_v38 = vadd.f32 %v677_v37, %v3574_v29  ;;  %v679_v41 = vpop.f32.mrb[73].mxu0  ;;  %v1170_v49 = vsel %vm914_vm8, %v672_v18, %v1042_v28 }
 0x1ee   :  { %v680_v42 = vadd.f32 %v679_v41, %v3576_v30  ;;  %v1171_v45 = vsel %vm915_vm7, %v674_v23, %v1043_v35 }
 0x1ef   :  { %v1044_v47 = vmul.f32 0.01, %v678_v38  ;;  %1506 = vmatprep.mubr.f32.mxu1 %v1171_v45  ;;  %vm916_vm10 = vcmp.ge.f32.partialorder %v678_v38, 0.0 }
 0x1f0   :  { %v1045_v50 = vmul.f32 0.01, %v680_v42  ;;  %v683_v53 = vpop.f32.mrb[74].mxu0  ;;  %1507 = vmatmul.mubr.f32.gmra.mrb[102].mxu1 %v1170_v49  ;;  %vm917_vm9 = vcmp.ge.f32.partialorder %v680_v42, 0.0 }
 0x1f1   :  { %v684_v55 = vadd.f32 %v683_v53, %v3574_v29  ;;  %v685_v56 = vpop.f32.mrb[75].mxu0  ;;  %v1172_v2 = vsel %vm916_vm10, %v678_v38, %v1044_v47 }
 0x1f2   :  { %v686_v58 = vadd.f32 %v685_v56, %v3576_v30  ;;  %v1173_v62 = vsel %vm917_vm9, %v680_v42, %v1045_v50 }
 0x1f3   :  { %v1046_v63 = vmul.f32 0.01, %v684_v55  ;;  %1511 = vmatprep.mubr.f32.mxu1 %v1173_v62  ;;  %vm918_vm12 = vcmp.ge.f32.partialorder %v684_v55, 0.0 }
 0x1f4   :  { %v1047_v46 = vmul.f32 0.01, %v686_v58  ;;  %v689_v3 = vpop.f32.mrb[76].mxu0  ;;  %1512 = vmatmul.mubr.f32.gmra.mrb[104].mxu1 %v1172_v2  ;;  %vm919_vm11 = vcmp.ge.f32.partialorder %v686_v58, 0.0 }
 0x1f5   :  { %v690_v4 = vadd.f32 %v689_v3, %v3574_v29  ;;  %v691_v6 = vpop.f32.mrb[77].mxu0  ;;  %v1174_v16 = vsel %vm918_vm12, %v684_v55, %v1046_v63 }
 0x1f6   :  { %v692_v11 = vadd.f32 %v691_v6, %v3576_v30  ;;  %v1175_v12 = vsel %vm919_vm11, %v686_v58, %v1047_v46 }
 0x1f7   :  { %v1048_v15 = vmul.f32 0.01, %v690_v4  ;;  %1516 = vmatprep.mubr.f32.mxu1 %v1175_v12  ;;  %vm920_vm14 = vcmp.ge.f32.partialorder %v690_v4, 0.0 }
 0x1f8   :  { %v1049_v18 = vmul.f32 0.01, %v692_v11  ;;  %v695_v21 = vpop.f32.mrb[78].mxu0  ;;  %1517 = vmatmul.mubr.f32.gmra.mrb[106].mxu1 %v1174_v16  ;;  %vm921_vm13 = vcmp.ge.f32.partialorder %v692_v11, 0.0 }
 0x1f9   :  { %v696_v23 = vadd.f32 %v695_v21, %v3574_v29  ;;  %v697_v25 = vpop.f32.mrb[79].mxu0  ;;  %v1176_v37 = vsel %vm920_vm14, %v690_v4, %v1048_v15 }
 0x1fa   :  { %v698_v28 = vadd.f32 %v697_v25, %v3576_v30  ;;  %v1177_v32 = vsel %vm921_vm13, %v692_v11, %v1049_v18 }
 0x1fb   :  { %v1050_v35 = vmul.f32 0.01, %v696_v23  ;;  %1521 = vmatprep.mubr.f32.mxu1 %v1177_v32  ;;  %vm922_vm0 = vcmp.ge.f32.partialorder %v696_v23, 0.0 }
 0x1fc   :  { %v1051_v38 = vmul.f32 0.01, %v698_v28  ;;  %v701_v41 = vpop.f32.mrb[80].mxu0  ;;  %1522 = vmatmul.mubr.f32.gmra.mrb[108].mxu1 %v1176_v37  ;;  %vm923_vm15 = vcmp.ge.f32.partialorder %v698_v28, 0.0 }
 0x1fd   :  { %v702_v42 = vadd.f32 %v701_v41, %v3574_v29  ;;  %v703_v45 = vpop.f32.mrb[81].mxu0  ;;  %v1178_v53 = vsel %vm922_vm0, %v696_v23, %v1050_v35 }
 0x1fe   :  { %v704_v47 = vadd.f32 %v703_v45, %v3576_v30  ;;  %v1179_v49 = vsel %vm923_vm15, %v698_v28, %v1051_v38 }
 0x1ff   :  { %v1052_v50 = vmul.f32 0.01, %v702_v42  ;;  %1526 = vmatprep.mubr.f32.mxu1 %v1179_v49  ;;  %vm924_vm2 = vcmp.ge.f32.partialorder %v702_v42, 0.0 }
 0x200   :  { %v1053_v55 = vmul.f32 0.01, %v704_v47  ;;  %v707_v56 = vpop.f32.mrb[82].mxu0  ;;  %1527 = vmatmul.mubr.f32.gmra.mrb[110].mxu1 %v1178_v53  ;;  %vm925_vm1 = vcmp.ge.f32.partialorder %v704_v47, 0.0 }
 0x201   :  { %v708_v58 = vadd.f32 %v707_v56, %v3574_v29  ;;  %v709_v62 = vpop.f32.mrb[83].mxu0  ;;  %v1180_v3 = vsel %vm924_vm2, %v702_v42, %v1052_v50 }
 0x202   :  { %v710_v63 = vadd.f32 %v709_v62, %v3576_v30  ;;  %v1181_v2 = vsel %vm925_vm1, %v704_v47, %v1053_v55 }
 0x203   :  { %v1054_v46 = vmul.f32 0.01, %v708_v58  ;;  %1531 = vmatprep.mubr.f32.mxu1 %v1181_v2  ;;  %vm926_vm4 = vcmp.ge.f32.partialorder %v708_v58, 0.0 }
 0x204   :  { %v1055_v4 = vmul.f32 0.01, %v710_v63  ;;  %v713_v6 = vpop.f32.mrb[84].mxu0  ;;  %1532 = vmatmul.mubr.f32.gmra.mrb[112].mxu1 %v1180_v3  ;;  %vm927_vm3 = vcmp.ge.f32.partialorder %v710_v63, 0.0 }
 0x205   :  { %v714_v11 = vadd.f32 %v713_v6, %v3574_v29  ;;  %v715_v12 = vpop.f32.mrb[85].mxu0  ;;  %v1182_v21 = vsel %vm926_vm4, %v708_v58, %v1054_v46 }
 0x206   :  { %v716_v15 = vadd.f32 %v715_v12, %v3576_v30  ;;  %v1183_v16 = vsel %vm927_vm3, %v710_v63, %v1055_v4 }
 0x207   :  { %v1056_v18 = vmul.f32 0.01, %v714_v11  ;;  %1536 = vmatprep.mubr.f32.mxu1 %v1183_v16  ;;  %vm928_vm6 = vcmp.ge.f32.partialorder %v714_v11, 0.0 }
 0x208   :  { %v1057_v23 = vmul.f32 0.01, %v716_v15  ;;  %v719_v25 = vpop.f32.mrb[86].mxu0  ;;  %1537 = vmatmul.mubr.f32.gmra.mrb[114].mxu1 %v1182_v21  ;;  %vm929_vm5 = vcmp.ge.f32.partialorder %v716_v15, 0.0 }
 0x209   :  { %v720_v28 = vadd.f32 %v719_v25, %v3574_v29  ;;  %v721_v32 = vpop.f32.mrb[87].mxu0  ;;  %v1184_v41 = vsel %vm928_vm6, %v714_v11, %v1056_v18 }
 0x20a   :  { %v722_v35 = vadd.f32 %v721_v32, %v3576_v30  ;;  %v1185_v37 = vsel %vm929_vm5, %v716_v15, %v1057_v23  ;;  %v752_v23 = vadd.f32 %v3593_v17, %v3576_v30 }
 0x20b   :  { %v1058_v38 = vmul.f32 0.01, %v720_v28  ;;  %1541 = vmatprep.mubr.f32.mxu1 %v1185_v37  ;;  %vm930_vm8 = vcmp.ge.f32.partialorder %v720_v28, 0.0 }
 0x20c   :  { %v1059_v42 = vmul.f32 0.01, %v722_v35  ;;  %v725_v45 = vpop.f32.mrb[88].mxu0  ;;  %1542 = vmatmul.mubr.f32.gmra.mrb[116].mxu1 %v1184_v41  ;;  %vm931_vm7 = vcmp.ge.f32.partialorder %v722_v35, 0.0  ;;  %vm941_vm1 = vcmp.ge.f32.partialorder %v752_v23, 0.0 }
 0x20d   :  { %v726_v47 = vadd.f32 %v725_v45, %v3574_v29  ;;  %v727_v49 = vpop.f32.mrb[89].mxu0  ;;  %v1186_v56 = vsel %vm930_vm8, %v720_v28, %v1058_v38  ;;  %v750_v45 = vadd.f32 %v3590_v14, %v3574_v29 }
 0x20e   :  { %v728_v50 = vadd.f32 %v727_v49, %v3576_v30  ;;  %v1187_v53 = vsel %vm931_vm7, %v722_v35, %v1059_v42 }
 0x20f   :  { %v1060_v55 = vmul.f32 0.01, %v726_v47  ;;  %1546 = vmatprep.mubr.f32.mxu1 %v1187_v53  ;;  %vm932_vm10 = vcmp.ge.f32.partialorder %v726_v47, 0.0  ;;  %vm940_vm2 = vcmp.ge.f32.partialorder %v750_v45, 0.0 }
 0x210   :  { %v1061_v58 = vmul.f32 0.01, %v728_v50  ;;  %v731_v62 = vpop.f32.mrb[90].mxu0  ;;  %1547 = vmatmul.mubr.f32.gmra.mrb[118].mxu1 %v1186_v56  ;;  %vm933_vm9 = vcmp.ge.f32.partialorder %v728_v50, 0.0  ;;  %v1068_v56 = vmul.f32 0.01, %v750_v45 }
 0x211   :  { %v732_v63 = vadd.f32 %v731_v62, %v3574_v29  ;;  %v733_v2 = vpop.f32.mrb[91].mxu0  ;;  %v1188_v6 = vsel %vm932_vm10, %v726_v47, %v1060_v55  ;;  %v1069_v47 = vmul.f32 0.01, %v752_v23 }
 0x212   :  { %v734_v46 = vadd.f32 %v733_v2, %v3576_v30  ;;  %v1189_v3 = vsel %vm933_vm9, %v728_v50, %v1061_v58  ;;  %v758_v50 = vadd.f32 %v3600_v31, %v3576_v30  ;;  %v756_v58 = vadd.f32 %v3597_v26, %v3574_v29 }
 0x213   :  { %v1062_v4 = vmul.f32 0.01, %v732_v63  ;;  %1551 = vmatprep.mubr.f32.mxu1 %v1189_v3  ;;  %vm934_vm12 = vcmp.ge.f32.partialorder %v732_v63, 0.0  ;;  %v1197_v2 = vsel %vm941_vm1, %v752_v23, %v1069_v47  ;;  %v1196_v3 = vsel %vm940_vm2, %v750_v45, %v1068_v56 }
 0x214   :  { %v1063_v11 = vmul.f32 0.01, %v734_v46  ;;  %v737_v12 = vpop.f32.mrb[92].mxu0  ;;  %1552 = vmatmul.mubr.f32.gmra.mrb[120].mxu1 %v1188_v6  ;;  %vm935_vm11 = vcmp.ge.f32.partialorder %v734_v46, 0.0  ;;  %v1071_v14 = vmul.f32 0.01, %v758_v50  ;;  %v770_v26 = vadd.f32 %v3612_v54, %v3576_v30 }
 0x215   :  { %v738_v15 = vadd.f32 %v737_v12, %v3574_v29  ;;  %v739_v16 = vpop.f32.mrb[93].mxu0  ;;  %v1190_v28 = vsel %vm934_vm12, %v732_v63, %v1062_v4  ;;  %v764_v63 = vadd.f32 %v3606_v43, %v3576_v30  ;;  %vm943_vm3 = vcmp.ge.f32.partialorder %v758_v50, 0.0 }
 0x216   :  { %v740_v18 = vadd.f32 %v739_v16, %v3576_v30  ;;  %v1191_v21 = vsel %vm935_vm11, %v734_v46, %v1063_v11  ;;  %v1070_v31 = vmul.f32 0.01, %v756_v58  ;;  %v762_v46 = vadd.f32 %v3603_v39, %v3574_v29 }
 0x217   :  { %v1064_v25 = vmul.f32 0.01, %v738_v15  ;;  %1556 = vmatprep.mubr.f32.mxu1 %v1191_v21  ;;  %vm936_vm14 = vcmp.ge.f32.partialorder %v738_v15, 0.0  ;;  %v1073_v4 = vmul.f32 0.01, %v764_v63  ;;  %v1199_v6 = vsel %vm943_vm3, %v758_v50, %v1071_v14 }
 0x218   :  { %v1065_v32 = vmul.f32 0.01, %v740_v18  ;;  %v743_v35 = vpop.f32.mrb[94].mxu0  ;;  %1557 = vmatmul.mubr.f32.gmra.mrb[122].mxu1 %v1190_v28  ;;  %vm937_vm13 = vcmp.ge.f32.partialorder %v740_v18, 0.0  ;;  %vm942_vm4 = vcmp.ge.f32.partialorder %v756_v58, 0.0  ;;  %vm945_vm5 = vcmp.ge.f32.partialorder %v764_v63, 0.0 }
 0x219   :  { %v744_v37 = vadd.f32 %v743_v35, %v3574_v29  ;;  %v745_v38 = vpop.f32.mrb[95].mxu0  ;;  %v1192_v17 = vsel %vm936_vm14, %v738_v15, %v1064_v25  ;;  %v1072_v43 = vmul.f32 0.01, %v762_v46  ;;  %v768_v11 = vadd.f32 %v3609_v51, %v3574_v29 }
 0x21a   :  { %v746_v41 = vadd.f32 %v745_v38, %v3576_v30  ;;  %v1193_v42 = vsel %vm937_vm13, %v740_v18, %v1065_v32  ;;  %v1198_v12 = vsel %vm942_vm4, %v756_v58, %v1070_v31  ;;  %v1075_v15 = vmul.f32 0.01, %v770_v26 }
 0x21b   :  { %v1066_v49 = vmul.f32 0.01, %v744_v37  ;;  %1561 = vmatprep.mubr.f32.mxu1 %v1193_v42  ;;  %vm938_vm0 = vcmp.ge.f32.partialorder %v744_v37, 0.0  ;;  %v776_v16 = vadd.f32 %v3618_v1, %v3576_v30  ;;  %v1201_v39 = vsel %vm945_vm5, %v764_v63, %v1073_v4 }
 0x21c   :  { %v1067_v53 = vmul.f32 0.01, %v746_v41  ;;  %1562 = vmatmul.mubr.f32.gmra.mrb[124].mxu1 %v1192_v17  ;;  %vm939_vm15 = vcmp.ge.f32.partialorder %v746_v41, 0.0  ;;  %vm944_vm6 = vcmp.ge.f32.partialorder %v762_v46, 0.0  ;;  %vm947_vm7 = vcmp.ge.f32.partialorder %v770_v26, 0.0 }
 0x21d   :  { %v1194_v62 = vsel %vm938_vm0, %v744_v37, %v1066_v49  ;;  %v1074_v54 = vmul.f32 0.01, %v768_v11  ;;  %v774_v18 = vadd.f32 %v3615_v61, %v3574_v29  ;;  %v1200_v21 = vsel %vm944_vm6, %v762_v46, %v1072_v43 }
 0x21e   :  { %v1195_v55 = vsel %vm939_vm15, %v746_v41, %v1067_v53  ;;  %v1077_v23 = vmul.f32 0.01, %v776_v16  ;;  %v782_v25 = vadd.f32 %v3624_v10, %v3576_v30  ;;  %v1203_v51 = vsel %vm947_vm7, %v770_v26, %v1075_v15 }
 0x21f   :  { %1566 = vmatprep.mubr.f32.mxu1 %v1195_v55  ;;  %vm946_vm8 = vcmp.ge.f32.partialorder %v768_v11, 0.0  ;;  %vm949_vm9 = vcmp.ge.f32.partialorder %v776_v16, 0.0  ;;  %v1076_v1 = vmul.f32 0.01, %v774_v18  ;;  %v780_v28 = vadd.f32 %v3621_v7, %v3574_v29 }
 0x220   :  { %1567 = vmatmul.mubr.f32.gmra.mrb[126].mxu1 %v1194_v62  ;;  %v788_v32 = vadd.f32 %v3630_v22, %v3576_v30  ;;  %v1202_v35 = vsel %vm946_vm8, %v768_v11, %v1074_v54  ;;  %v1079_v37 = vmul.f32 0.01, %v782_v25  ;;  %v1205_v61 = vsel %vm949_vm9, %v776_v16, %v1077_v23  ;;  %v3768_v22 = vld [vmem:[#allocation10] ss:$0 sm:$0xff] }
 0x221   :  { %1571 = vmatprep.mubr.f32.mxu1 %v1197_v2  ;;  %vm948_vm10 = vcmp.ge.f32.partialorder %v774_v18, 0.0  ;;  %vm951_vm11 = vcmp.ge.f32.partialorder %v782_v25, 0.0  ;;  %v786_v10 = vadd.f32 %v3627_v19, %v3574_v29  ;;  %v1078_v38 = vmul.f32 0.01, %v780_v28 }
 0x222   :  { %v1081_v41 = vmul.f32 0.01, %v788_v32  ;;  %v794_v42 = vadd.f32 %v3636_v0, %v3576_v30  ;;  %v1204_v45 = vsel %vm948_vm10, %v774_v18, %v1076_v1  ;;  %v1207_v7 = vsel %vm951_vm11, %v782_v25, %v1079_v37 }
 0x223   :  { %vm950_vm12 = vcmp.ge.f32.partialorder %v780_v28, 0.0  ;;  %vm953_vm13 = vcmp.ge.f32.partialorder %v788_v32, 0.0  ;;  %v1080_v47 = vmul.f32 0.01, %v786_v10  ;;  %v792_v49 = vadd.f32 %v3633_v33, %v3574_v29 }
 0x224   :  { %1572 = vmatmul.mubr.f32.gmra.mrb[128].mxu1 %v1196_v3  ;;  %v1083_v17 = vmul.f32 0.01, %v794_v42  ;;  %v1206_v19 = vsel %vm950_vm12, %v780_v28, %v1078_v38  ;;  %v1209_v53 = vsel %vm953_vm13, %v788_v32, %v1081_v41  ;;  %vm1660_vm14 = vcmask 523264  }
 0x225   :  { %1576 = vmatprep.mubr.f32.mxu1 %v1199_v6  ;;  %v800_v0 = vadd.f32 %v3642_v48, %v3576_v30  ;;  %vm952_vm15 = vcmp.ge.f32.partialorder %v786_v10, 0.0  ;;  %vm955_vm0 = vcmp.ge.f32.partialorder %v794_v42, 0.0  ;;  %v1082_v58 = vmul.f32 0.01, %v792_v49 }
 0x226   :  { %v798_v33 = vadd.f32 %v3639_v44, %v3574_v29  ;;  %v1208_v14 = vsel %vm952_vm15, %v786_v10, %v1080_v47  ;;  %v1211_v63 = vsel %vm955_vm0, %v794_v42, %v1083_v17  ;;  %v806_v48 = vadd.f32 %v3648_v60, %v3576_v30 }
 0x227   :  { %v1085_v2 = vmul.f32 0.01, %v800_v0  ;;  %vm954_vm1 = vcmp.ge.f32.partialorder %v792_v49, 0.0  ;;  %vm957_vm2 = vcmp.ge.f32.partialorder %v800_v0, 0.0  ;;  %v804_v44 = vadd.f32 %v3645_v57, %v3574_v29 }
 0x228   :  { %1577 = vmatmul.mubr.f32.gmra.mrb[130].mxu1 %v1198_v12  ;;  %v1084_v3 = vmul.f32 0.01, %v798_v33  ;;  %v812_v4 = vadd.f32 %v3654_v9, %v3576_v30  ;;  %v1210_v6 = vsel %vm954_vm1, %v792_v49, %v1082_v58  ;;  %v1087_v43 = vmul.f32 0.01, %v806_v48 }
 0x229   :  { %1581 = vmatprep.mubr.f32.mxu1 %v1201_v39  ;;  %v1213_v12 = vsel %vm957_vm2, %v800_v0, %v1085_v2  ;;  %vm956_vm3 = vcmp.ge.f32.partialorder %v798_v33, 0.0  ;;  %vm959_vm4 = vcmp.ge.f32.partialorder %v806_v48, 0.0  ;;  %v810_v15 = vadd.f32 %v3651_v5, %v3574_v29 }
 0x22a   :  { %v1086_v57 = vmul.f32 0.01, %v804_v44  ;;  %v1089_v16 = vmul.f32 0.01, %v812_v4  ;;  %v818_v9 = vadd.f32 %v3660_v24, %v3576_v30  ;;  %v1212_v54 = vsel %vm956_vm3, %v798_v33, %v1084_v3 }
 0x22b   :  { %v1215_v23 = vsel %vm959_vm4, %v806_v48, %v1087_v43  ;;  %vm958_vm5 = vcmp.ge.f32.partialorder %v804_v44, 0.0  ;;  %vm961_vm6 = vcmp.ge.f32.partialorder %v812_v4, 0.0  ;;  %v1088_v25 = vmul.f32 0.01, %v810_v15 }
 0x22c   :  { %1582 = vmatmul.mubr.f32.gmra.mrb[132].mxu1 %v1200_v21  ;;  %v816_v5 = vadd.f32 %v3657_v20, %v3574_v29  ;;  %v1214_v28 = vsel %vm958_vm5, %v804_v44, %v1086_v57  ;;  %v1217_v24 = vsel %vm961_vm6, %v812_v4, %v1089_v16  ;;  %v824_v32 = vadd.f32 %v3666_v40, %v3576_v30 }
 0x22d   :  { %1586 = vmatprep.mubr.f32.mxu1 %v1203_v51  ;;  %v1091_v51 = vmul.f32 0.01, %v818_v9  ;;  %vm960_vm7 = vcmp.ge.f32.partialorder %v810_v15, 0.0  ;;  %vm963_vm8 = vcmp.ge.f32.partialorder %v818_v9, 0.0  ;;  %v822_v20 = vadd.f32 %v3663_v36, %v3574_v29 }
 0x22e   :  { %v1216_v38 = vsel %vm960_vm7, %v810_v15, %v1088_v25  ;;  %v1093_v42 = vmul.f32 0.01, %v824_v32  ;;  %v830_v40 = vadd.f32 %v3672_v59, %v3576_v30  ;;  %vm962_vm9 = vcmp.ge.f32.partialorder %v816_v5, 0.0 }
 0x22f   :  { %v1219_v41 = vsel %vm963_vm8, %v818_v9, %v1091_v51  ;;  %vm965_vm10 = vcmp.ge.f32.partialorder %v824_v32, 0.0  ;;  %v1092_v47 = vmul.f32 0.01, %v822_v20  ;;  %v828_v36 = vadd.f32 %v3669_v52, %v3574_v29 }
 0x230   :  { %1587 = vmatmul.mubr.f32.gmra.mrb[134].mxu1 %v1202_v35  ;;  %v836_v49 = vadd.f32 %v3678_v13, %v3576_v30  ;;  %v1221_v0 = vsel %vm965_vm10, %v824_v32, %v1093_v42  ;;  %vm964_vm11 = vcmp.ge.f32.partialorder %v822_v20, 0.0  ;;  %vm967_vm12 = vcmp.ge.f32.partialorder %v830_v40, 0.0 }
 0x231   :  { %1591 = vmatprep.mubr.f32.mxu1 %v1205_v61  ;;  %v1090_v61 = vmul.f32 0.01, %v816_v5  ;;  %v834_v52 = vadd.f32 %v3675_v8, %v3574_v29  ;;  %v1220_v13 = vsel %vm964_vm11, %v822_v20, %v1092_v47  ;;  %v842_v33 = vadd.f32 %v3684_v34, %v3576_v30 }
 0x232   :  { %vm966_vm13 = vcmp.ge.f32.partialorder %v828_v36, 0.0  ;;  %vm969_vm15 = vcmp.ge.f32.partialorder %v836_v49, 0.0  ;;  %v840_v8 = vadd.f32 %v3681_v27, %v3574_v29  ;;  %vm2494_vm3 = vcmask 519168  }
 0x233   :  { %v1096_v2 = vmul.f32 0.01, %v834_v52  ;;  %vm968_vm0 = vcmp.ge.f32.partialorder %v834_v52, 0.0  ;;  %vm971_vm1 = vcmp.ge.f32.partialorder %v842_v33, 0.0 }
 0x234   :  { %1592 = vmatmul.mubr.f32.gmra.mrb[136].mxu1 %v1204_v45  ;;  %v1098_v44 = vmul.f32 0.01, %v840_v8  ;;  %vm970_vm2 = vcmp.ge.f32.partialorder %v840_v8, 0.0 }
 0x235   :  { %1596 = vmatprep.mubr.f32.mxu1 %v1207_v7 }
 0x237   :  { %v1333_v50 = vpop.f32.mrb[32].mxu1 }
 0x238   :  { %v1334_v55 = vadd.f32 %v3768_v22, %v1333_v50  ;;  %v1335_v56 = vpop.f32.mrb[33].mxu1  ;;  %1597 = vmatmul.mubr.f32.gmra.mrb[138].mxu1 %v1206_v19  ;;  %v1218_v50 = vsel %vm962_vm9, %v816_v5, %v1090_v61  ;;  %v1095_v19 = vmul.f32 0.01, %v830_v40 }
 0x239   :  { %1601 = vmatprep.mubr.f32.mxu1 %v1209_v53  ;;  %v1097_v56 = vmul.f32 0.01, %v836_v49 }
 0x23a   :  { %2924 = vmatprep.mubr.msk.f32.mxu0 %vm1660_vm14, %v1334_v55  ;;  %v1094_v55 = vmul.f32 0.01, %v828_v36 }
 0x23b   :  { %v1338_v62 = vpop.f32.mrb[34].mxu1  ;;  %v1225_v34 = vsel %vm969_vm15, %v836_v49, %v1097_v56 }
 0x23c   :  { %v1339_v31 = vadd.f32 %v3768_v22, %v1338_v62  ;;  %v1340_v46 = vpop.f32.mrb[35].mxu1  ;;  %1602 = vmatmul.mubr.f32.gmra.mrb[140].mxu1 %v1208_v14 }
 0x23d   :  { %1606 = vmatprep.mubr.f32.mxu1 %v1211_v63  ;;  %v1223_v63 = vsel %vm967_vm12, %v830_v40, %v1095_v19  ;;  %v1099_v46 = vmul.f32 0.01, %v842_v33 }
 0x23e   :  { %2925 = vmatmul.mubr.msk.f32.vlgmr.msra.gmra.mrb[96].mxu0 %vm1660_vm14, %v1339_v31  ;;  %v1222_v31 = vsel %vm966_vm13, %v828_v36, %v1094_v55 }
 0x23f   :  { %v1343_v26 = vpop.f32.mrb[36].mxu1  ;;  %v1227_v29 = vsel %vm971_vm1, %v842_v33, %v1099_v46 }
 0x240   :  { %v1344_v60 = vadd.f32 %v3768_v22, %v1343_v26  ;;  %v1345_v11 = vpop.f32.mrb[37].mxu1  ;;  %1607 = vmatmul.mubr.f32.gmra.mrb[142].mxu1 %v1210_v6  ;;  %v1224_v26 = vsel %vm968_vm0, %v834_v52, %v1096_v2 }
 0x241   :  { %1611 = vmatprep.mubr.f32.mxu1 %v1213_v12 }
 0x242   :  { %2927 = vmatprep.mubr.msk.f32.mxu0 %vm1660_vm14, %v1344_v60  ;;  %v1226_v60 = vsel %vm970_vm2, %v840_v8, %v1098_v44 }
 0x243   :  { %v1348_v39 = vpop.f32.mrb[38].mxu1 }
 0x244   :  { %v1349_v18 = vadd.f32 %v3768_v22, %v1348_v39  ;;  %v1350_v21 = vpop.f32.mrb[39].mxu1  ;;  %1612 = vmatmul.mubr.f32.gmra.mrb[144].mxu1 %v1212_v54 }
 0x245   :  { %1616 = vmatprep.mubr.f32.mxu1 %v1215_v23 }
 0x246   :  { %2928 = vmatmul.mubr.msk.f32.gmra.mrb[98].mxu0 %vm1660_vm14, %v1349_v18 }
 0x247   :  { %v1353_v1 = vpop.f32.mrb[40].mxu1 }
 0x248   :  { %v1354_v35 = vadd.f32 %v3768_v22, %v1353_v1  ;;  %v1355_v37 = vpop.f32.mrb[41].mxu1  ;;  %1617 = vmatmul.mubr.f32.gmra.mrb[146].mxu1 %v1214_v28 }
 0x249   :  { %1621 = vmatprep.mubr.f32.mxu1 %v1217_v24 }
 0x24a   :  { %2930 = vmatprep.mubr.msk.f32.mxu0 %vm1660_vm14, %v1354_v35 }
 0x24b   :  { %v1358_v10 = vpop.f32.mrb[42].mxu1 }
 0x24c   :  { %v1359_v45 = vadd.f32 %v3768_v22, %v1358_v10  ;;  %v1360_v7 = vpop.f32.mrb[43].mxu1  ;;  %1622 = vmatmul.mubr.f32.gmra.mrb[148].mxu1 %v1216_v38 }
 0x24d   :  { %1626 = vmatprep.mubr.f32.mxu1 %v1219_v41 }
 0x24e   :  { %2931 = vmatmul.mubr.msk.f32.gmra.mrb[100].mxu0 %vm1660_vm14, %v1359_v45 }
 0x24f   :  { %v1363_v17 = vpop.f32.mrb[44].mxu1 }
 0x250   :  { %v1364_v59 = vadd.f32 %v3768_v22, %v1363_v17  ;;  %v1365_v53 = vpop.f32.mrb[45].mxu1  ;;  %1627 = vmatmul.mubr.f32.gmra.mrb[150].mxu1 %v1218_v50 }
 0x251   :  { %1631 = vmatprep.mubr.f32.mxu1 %v1221_v0 }
 0x252   :  { %2933 = vmatprep.mubr.msk.f32.mxu0 %vm1660_vm14, %v1364_v59 }
 0x253   :  { %v1368_v58 = vpop.f32.mrb[46].mxu1 }
 0x254   :  { %v1369_v62 = vadd.f32 %v3768_v22, %v1368_v58  ;;  %v1370_v14 = vpop.f32.mrb[47].mxu1  ;;  %1632 = vmatmul.mubr.f32.gmra.mrb[152].mxu1 %v1220_v13 }
 0x255   :  { %1636 = vmatprep.mubr.f32.mxu1 %v1223_v63 }
 0x256   :  { %2934 = vmatmul.mubr.msk.f32.gmra.mrb[102].mxu0 %vm1660_vm14, %v1369_v62 }
 0x257   :  { %v1373_v48 = vpop.f32.mrb[48].mxu1 }
 0x258   :  { %v1374_v3 = vadd.f32 %v3768_v22, %v1373_v48  ;;  %v1375_v30 = vpop.f32.mrb[49].mxu1  ;;  %1637 = vmatmul.mubr.f32.gmra.mrb[154].mxu1 %v1222_v31 }
 0x259   :  { %1641 = vmatprep.mubr.f32.mxu1 %v1225_v34 }
 0x25a   :  { %2936 = vmatprep.mubr.msk.f32.mxu0 %vm1660_vm14, %v1374_v3 }
 0x25b   :  { %v1378_v4 = vpop.f32.mrb[50].mxu1 }
 0x25c   :  { %v1379_v6 = vadd.f32 %v3768_v22, %v1378_v4  ;;  %v1380_v43 = vpop.f32.mrb[51].mxu1  ;;  %1642 = vmatmul.mubr.f32.gmra.mrb[156].mxu1 %v1224_v26 }
 0x25d   :  { %1646 = vmatprep.mubr.f32.mxu1 %v1227_v29 }
 0x25e   :  { %2937 = vmatmul.mubr.msk.f32.gmra.mrb[104].mxu0 %vm1660_vm14, %v1379_v6 }
 0x25f   :  { %v1383_v27 = vpop.f32.mrb[52].mxu1 }
 0x260   :  { %v1384_v11 = vadd.f32 %v3768_v22, %v1383_v27  ;;  %v1385_v12 = vpop.f32.mrb[53].mxu1  ;;  %1647 = vmatmul.mubr.f32.gmra.mrb[158].mxu1 %v1226_v60 }
 0x262   :  { %2939 = vmatprep.mubr.msk.f32.mxu0 %vm1660_vm14, %v1384_v11 }
 0x263   :  { %v1388_v15 = vpop.f32.mrb[54].mxu1 }
 0x264   :  { %v1389_v57 = vadd.f32 %v3768_v22, %v1388_v15  ;;  %v1390_v16 = vpop.f32.mrb[55].mxu1 }
 0x266   :  { %2940 = vmatmul.mubr.msk.f32.gmra.mrb[106].mxu0 %vm1660_vm14, %v1389_v57 }
 0x267   :  { %v1393_v9 = vpop.f32.mrb[56].mxu1 }
 0x268   :  { %v1394_v39 = vadd.f32 %v3768_v22, %v1393_v9  ;;  %v1395_v54 = vpop.f32.mrb[57].mxu1 }
 0x26a   :  { %2942 = vmatprep.mubr.msk.f32.mxu0 %vm1660_vm14, %v1394_v39 }
 0x26b   :  { %v1398_v18 = vpop.f32.mrb[58].mxu1 }
 0x26c   :  { %v1399_v21 = vadd.f32 %v3768_v22, %v1398_v18  ;;  %v1400_v23 = vpop.f32.mrb[59].mxu1 }
 0x26e   :  { %2943 = vmatmul.mubr.msk.f32.gmra.mrb[108].mxu0 %vm1660_vm14, %v1399_v21 }
 0x26f   :  { %v1403_v25 = vpop.f32.mrb[60].mxu1 }
 0x270   :  { %v1404_v5 = vadd.f32 %v3768_v22, %v1403_v25  ;;  %v1405_v51 = vpop.f32.mrb[61].mxu1 }
 0x272   :  { %2945 = vmatprep.mubr.msk.f32.mxu0 %vm1660_vm14, %v1404_v5 }
 0x273   :  { %v1408_v1 = vpop.f32.mrb[62].mxu1 }
 0x274   :  { %v1409_v28 = vadd.f32 %v3768_v22, %v1408_v1  ;;  %v1410_v24 = vpop.f32.mrb[63].mxu1 }
 0x276   :  { %2946 = vmatmul.mubr.msk.f32.gmra.mrb[110].mxu0 %vm1660_vm14, %v1409_v28 }
 0x277   :  { %v1413_v32 = vpop.f32.mrb[64].mxu1 }
 0x278   :  { %v1414_v35 = vadd.f32 %v3768_v22, %v1413_v32  ;;  %v1415_v37 = vpop.f32.mrb[65].mxu1 }
 0x27a   :  { %2948 = vmatprep.mubr.msk.f32.mxu0 %vm1660_vm14, %v1414_v35 }
 0x27b   :  { %v1418_v61 = vpop.f32.mrb[66].mxu1 }
 0x27c   :  { %v1419_v20 = vadd.f32 %v3768_v22, %v1418_v61  ;;  %v1420_v10 = vpop.f32.mrb[67].mxu1 }
 0x27e   :  { %2949 = vmatmul.mubr.msk.f32.gmra.mrb[112].mxu0 %vm1660_vm14, %v1419_v20 }
 0x27f   :  { %v1423_v38 = vpop.f32.mrb[68].mxu1 }
 0x280   :  { %v1424_v41 = vadd.f32 %v3768_v22, %v1423_v38  ;;  %v1425_v42 = vpop.f32.mrb[69].mxu1 }
 0x282   :  { %2951 = vmatprep.mubr.msk.f32.mxu0 %vm1660_vm14, %v1424_v41 }
 0x283   :  { %v1428_v40 = vpop.f32.mrb[70].mxu1 }
 0x284   :  { %v1429_v45 = vadd.f32 %v3768_v22, %v1428_v40  ;;  %v1430_v7 = vpop.f32.mrb[71].mxu1 }
 0x286   :  { %2952 = vmatmul.mubr.msk.f32.gmra.mrb[114].mxu0 %vm1660_vm14, %v1429_v45 }
 0x287   :  { %v1433_v47 = vpop.f32.mrb[72].mxu1 }
 0x288   :  { %v1434_v36 = vadd.f32 %v3768_v22, %v1433_v47  ;;  %v1435_v49 = vpop.f32.mrb[73].mxu1 }
 0x28a   :  { %2954 = vmatprep.mubr.msk.f32.mxu0 %vm1660_vm14, %v1434_v36 }
 0x28b   :  { %v1438_v17 = vpop.f32.mrb[74].mxu1 }
 0x28c   :  { %v1439_v50 = vadd.f32 %v3768_v22, %v1438_v17  ;;  %v1440_v19 = vpop.f32.mrb[75].mxu1 }
 0x28e   :  { %2955 = vmatmul.mubr.msk.f32.gmra.mrb[116].mxu0 %vm1660_vm14, %v1439_v50 }
 0x28f   :  { %v1443_v59 = vpop.f32.mrb[76].mxu1 }
 0x290   :  { %v1444_v53 = vadd.f32 %v3768_v22, %v1443_v59  ;;  %v1445_v0 = vpop.f32.mrb[77].mxu1 }
 0x292   :  { %2957 = vmatprep.mubr.msk.f32.mxu0 %vm1660_vm14, %v1444_v53 }
 0x293   :  { %v1448_v55 = vpop.f32.mrb[78].mxu1 }
 0x294   :  { %v1449_v52 = vadd.f32 %v3768_v22, %v1448_v55  ;;  %v1450_v56 = vpop.f32.mrb[79].mxu1 }
 0x296   :  { %2958 = vmatmul.mubr.msk.f32.gmra.mrb[118].mxu0 %vm1660_vm14, %v1449_v52 }
 0x297   :  { %v1453_v58 = vpop.f32.mrb[80].mxu1 }
 0x298   :  { %v1454_v13 = vadd.f32 %v3768_v22, %v1453_v58  ;;  %v1455_v33 = vpop.f32.mrb[81].mxu1 }
 0x29a   :  { %2960 = vmatprep.mubr.msk.f32.mxu0 %vm1660_vm14, %v1454_v13 }
 0x29b   :  { %v1458_v62 = vpop.f32.mrb[82].mxu1 }
 0x29c   :  { %v1459_v14 = vadd.f32 %v3768_v22, %v1458_v62  ;;  %v1460_v63 = vpop.f32.mrb[83].mxu1 }
 0x29e   :  { %2961 = vmatmul.mubr.msk.f32.gmra.mrb[120].mxu0 %vm1660_vm14, %v1459_v14 }
 0x29f   :  { %v1463_v2 = vpop.f32.mrb[84].mxu1 }
 0x2a0   :  { %v1464_v8 = vadd.f32 %v3768_v22, %v1463_v2  ;;  %v1465_v48 = vpop.f32.mrb[85].mxu1 }
 0x2a2   :  { %2963 = vmatprep.mubr.msk.f32.mxu0 %vm1660_vm14, %v1464_v8 }
 0x2a3   :  { %v1468_v31 = vpop.f32.mrb[86].mxu1 }
 0x2a4   :  { %v1469_v46 = vadd.f32 %v3768_v22, %v1468_v31  ;;  %v1470_v3 = vpop.f32.mrb[87].mxu1 }
 0x2a6   :  { %2964 = vmatmul.mubr.msk.f32.gmra.mrb[122].mxu0 %vm1660_vm14, %v1469_v46 }
 0x2a7   :  { %v1473_v30 = vpop.f32.mrb[88].mxu1 }
 0x2a8   :  { %v1474_v34 = vadd.f32 %v3768_v22, %v1473_v30  ;;  %v1475_v44 = vpop.f32.mrb[89].mxu1 }
 0x2aa   :  { %2966 = vmatprep.mubr.msk.f32.mxu0 %vm1660_vm14, %v1474_v34 }
 0x2ab   :  { %v1478_v4 = vpop.f32.mrb[90].mxu1 }
 0x2ac   :  { %v1479_v26 = vadd.f32 %v3768_v22, %v1478_v4  ;;  %v1480_v6 = vpop.f32.mrb[91].mxu1 }
 0x2ae   :  { %2967 = vmatmul.mubr.msk.f32.gmra.mrb[124].mxu0 %vm1660_vm14, %v1479_v26 }
 0x2af   :  { %v1483_v43 = vpop.f32.mrb[92].mxu1 }
 0x2b0   :  { %v1484_v29 = vadd.f32 %v3768_v22, %v1483_v43  ;;  %v1485_v27 = vpop.f32.mrb[93].mxu1 }
 0x2b2   :  { %2969 = vmatprep.mubr.msk.f32.mxu0 %vm1660_vm14, %v1484_v29 }
 0x2b3   :  { %v1488_v60 = vpop.f32.mrb[94].mxu1 }
 0x2b4   :  { %v1489_v11 = vadd.f32 %v3768_v22, %v1488_v60  ;;  %v1490_v12 = vpop.f32.mrb[95].mxu1 }
 0x2b6   :  { %2970 = vmatmul.mubr.msk.f32.gmra.mrb[126].mxu0 %vm1660_vm14, %v1489_v11 }
 0x2b7   :  { %v1493_v15 = vpop.f32.mrb[96].mxu1 }
 0x2b8   :  { %v1494_v57 = vadd.f32 %v3768_v22, %v1493_v15  ;;  %v1495_v16 = vpop.f32.mrb[97].mxu1 }
 0x2ba   :  { %2972 = vmatprep.mubr.msk.f32.mxu0 %vm1660_vm14, %v1494_v57 }
 0x2bb   :  { %v1498_v9 = vpop.f32.mrb[98].mxu1 }
 0x2bc   :  { %v1499_v39 = vadd.f32 %v3768_v22, %v1498_v9  ;;  %v1500_v54 = vpop.f32.mrb[99].mxu1 }
 0x2be   :  { %2973 = vmatmul.mubr.msk.f32.gmra.mrb[128].mxu0 %vm1660_vm14, %v1499_v39 }
 0x2bf   :  { %v1503_v18 = vpop.f32.mrb[100].mxu1 }
 0x2c0   :  { %v1504_v21 = vadd.f32 %v3768_v22, %v1503_v18  ;;  %v1505_v23 = vpop.f32.mrb[101].mxu1 }
 0x2c2   :  { %2975 = vmatprep.mubr.msk.f32.mxu0 %vm1660_vm14, %v1504_v21 }
 0x2c3   :  { %v1508_v25 = vpop.f32.mrb[102].mxu1 }
 0x2c4   :  { %v1509_v5 = vadd.f32 %v3768_v22, %v1508_v25  ;;  %v1510_v51 = vpop.f32.mrb[103].mxu1 }
 0x2c6   :  { %2976 = vmatmul.mubr.msk.f32.gmra.mrb[130].mxu0 %vm1660_vm14, %v1509_v5 }
 0x2c7   :  { %v1513_v1 = vpop.f32.mrb[104].mxu1 }
 0x2c8   :  { %v1514_v28 = vadd.f32 %v3768_v22, %v1513_v1  ;;  %v1515_v24 = vpop.f32.mrb[105].mxu1 }
 0x2ca   :  { %2978 = vmatprep.mubr.msk.f32.mxu0 %vm1660_vm14, %v1514_v28 }
 0x2cb   :  { %v1518_v32 = vpop.f32.mrb[106].mxu1 }
 0x2cc   :  { %v1519_v35 = vadd.f32 %v3768_v22, %v1518_v32  ;;  %v1520_v37 = vpop.f32.mrb[107].mxu1 }
 0x2ce   :  { %2979 = vmatmul.mubr.msk.f32.gmra.mrb[132].mxu0 %vm1660_vm14, %v1519_v35 }
 0x2cf   :  { %v1523_v61 = vpop.f32.mrb[108].mxu1 }
 0x2d0   :  { %v1524_v20 = vadd.f32 %v3768_v22, %v1523_v61  ;;  %v1525_v10 = vpop.f32.mrb[109].mxu1 }
 0x2d2   :  { %2981 = vmatprep.mubr.msk.f32.mxu0 %vm1660_vm14, %v1524_v20 }
 0x2d3   :  { %v1528_v38 = vpop.f32.mrb[110].mxu1 }
 0x2d4   :  { %v1529_v41 = vadd.f32 %v3768_v22, %v1528_v38  ;;  %v1530_v42 = vpop.f32.mrb[111].mxu1 }
 0x2d6   :  { %2982 = vmatmul.mubr.msk.f32.gmra.mrb[134].mxu0 %vm1660_vm14, %v1529_v41 }
 0x2d7   :  { %v1533_v40 = vpop.f32.mrb[112].mxu1 }
 0x2d8   :  { %v1534_v45 = vadd.f32 %v3768_v22, %v1533_v40  ;;  %v1535_v7 = vpop.f32.mrb[113].mxu1 }
 0x2da   :  { %2984 = vmatprep.mubr.msk.f32.mxu0 %vm1660_vm14, %v1534_v45 }
 0x2db   :  { %v1538_v47 = vpop.f32.mrb[114].mxu1 }
 0x2dc   :  { %v1539_v36 = vadd.f32 %v3768_v22, %v1538_v47  ;;  %v1540_v49 = vpop.f32.mrb[115].mxu1 }
 0x2de   :  { %2985 = vmatmul.mubr.msk.f32.gmra.mrb[136].mxu0 %vm1660_vm14, %v1539_v36 }
 0x2df   :  { %v1543_v17 = vpop.f32.mrb[116].mxu1 }
 0x2e0   :  { %v1544_v50 = vadd.f32 %v3768_v22, %v1543_v17  ;;  %v1545_v19 = vpop.f32.mrb[117].mxu1 }
 0x2e2   :  { %2987 = vmatprep.mubr.msk.f32.mxu0 %vm1660_vm14, %v1544_v50 }
 0x2e3   :  { %v1548_v59 = vpop.f32.mrb[118].mxu1 }
 0x2e4   :  { %v1549_v53 = vadd.f32 %v3768_v22, %v1548_v59  ;;  %v1550_v0 = vpop.f32.mrb[119].mxu1 }
 0x2e6   :  { %2988 = vmatmul.mubr.msk.f32.gmra.mrb[138].mxu0 %vm1660_vm14, %v1549_v53 }
 0x2e7   :  { %v1553_v55 = vpop.f32.mrb[120].mxu1 }
 0x2e8   :  { %v1554_v52 = vadd.f32 %v3768_v22, %v1553_v55  ;;  %v1555_v56 = vpop.f32.mrb[121].mxu1 }
 0x2ea   :  { %2990 = vmatprep.mubr.msk.f32.mxu0 %vm1660_vm14, %v1554_v52 }
 0x2eb   :  { %v1558_v58 = vpop.f32.mrb[122].mxu1 }
 0x2ec   :  { %v1559_v13 = vadd.f32 %v3768_v22, %v1558_v58  ;;  %v1560_v33 = vpop.f32.mrb[123].mxu1 }
 0x2ee   :  { %2991 = vmatmul.mubr.msk.f32.gmra.mrb[140].mxu0 %vm1660_vm14, %v1559_v13 }
 0x2ef   :  { %v1563_v62 = vpop.f32.mrb[124].mxu1 }
 0x2f0   :  { %v1564_v14 = vadd.f32 %v3768_v22, %v1563_v62  ;;  %v1565_v63 = vpop.f32.mrb[125].mxu1 }
 0x2f2   :  { %2993 = vmatprep.mubr.msk.f32.mxu0 %vm1660_vm14, %v1564_v14 }
 0x2f3   :  { %v1568_v2 = vpop.f32.mrb[126].mxu1 }
 0x2f4   :  { %v1569_v8 = vadd.f32 %v3768_v22, %v1568_v2  ;;  %v1570_v48 = vpop.f32.mrb[127].mxu1 }
 0x2f6   :  { %2994 = vmatmul.mubr.msk.f32.gmra.mrb[142].mxu0 %vm1660_vm14, %v1569_v8 }
 0x2f7   :  { %v1573_v31 = vpop.f32.mrb[128].mxu1 }
 0x2f8   :  { %v1574_v46 = vadd.f32 %v3768_v22, %v1573_v31  ;;  %v1575_v3 = vpop.f32.mrb[129].mxu1 }
 0x2fa   :  { %2996 = vmatprep.mubr.msk.f32.mxu0 %vm1660_vm14, %v1574_v46 }
 0x2fb   :  { %v1578_v30 = vpop.f32.mrb[130].mxu1 }
 0x2fc   :  { %v1579_v34 = vadd.f32 %v3768_v22, %v1578_v30  ;;  %v1580_v44 = vpop.f32.mrb[131].mxu1 }
 0x2fe   :  { %2997 = vmatmul.mubr.msk.f32.gmra.mrb[144].mxu0 %vm1660_vm14, %v1579_v34 }
 0x2ff   :  { %v1583_v4 = vpop.f32.mrb[132].mxu1 }
 0x300   :  { %v1584_v26 = vadd.f32 %v3768_v22, %v1583_v4  ;;  %v1585_v6 = vpop.f32.mrb[133].mxu1 }
 0x302   :  { %2999 = vmatprep.mubr.msk.f32.mxu0 %vm1660_vm14, %v1584_v26 }
 0x303   :  { %v1588_v43 = vpop.f32.mrb[134].mxu1 }
 0x304   :  { %v1589_v29 = vadd.f32 %v3768_v22, %v1588_v43  ;;  %v1590_v27 = vpop.f32.mrb[135].mxu1 }
 0x306   :  { %3000 = vmatmul.mubr.msk.f32.gmra.mrb[146].mxu0 %vm1660_vm14, %v1589_v29 }
 0x307   :  { %v1593_v60 = vpop.f32.mrb[136].mxu1 }
 0x308   :  { %v1594_v11 = vadd.f32 %v3768_v22, %v1593_v60  ;;  %v1595_v12 = vpop.f32.mrb[137].mxu1 }
 0x30a   :  { %3002 = vmatprep.mubr.msk.f32.mxu0 %vm1660_vm14, %v1594_v11 }
 0x30b   :  { %v1598_v15 = vpop.f32.mrb[138].mxu1 }
 0x30c   :  { %v1599_v57 = vadd.f32 %v3768_v22, %v1598_v15  ;;  %v1600_v16 = vpop.f32.mrb[139].mxu1 }
 0x30e   :  { %3003 = vmatmul.mubr.msk.f32.gmra.mrb[148].mxu0 %vm1660_vm14, %v1599_v57 }
 0x30f   :  { %v1603_v9 = vpop.f32.mrb[140].mxu1 }
 0x310   :  { %v1604_v39 = vadd.f32 %v3768_v22, %v1603_v9  ;;  %v1605_v54 = vpop.f32.mrb[141].mxu1 }
 0x311   :  { %v2926_v18 = vpop.f32.mrb[96].mxu0 }
 0x312   :  { %v2773_v21 = vpack.c.bf16 %v2926_v18, %v2926_v18  ;;  %v1919_v23 = vpop.f32.mrb[97].mxu0  ;;  %3005 = vmatprep.mubr.msk.f32.mxu0 %vm1660_vm14, %v1604_v39 }
 0x313   :  { %v2772_v25 = vpack.c.bf16 %v1919_v23, %v1919_v23  ;;  %v1608_v5 = vpop.f32.mrb[142].mxu1 }
 0x314   :  { %2496 = vst.msk [vmem:[#allocation13 + $0x4] sm:$0xf] %vm2494_vm3, %v2773_v21  ;;  %v1609_v51 = vadd.f32 %v3768_v22, %v1608_v5  ;;  %v1610_v1 = vpop.f32.mrb[143].mxu1 }
 0x315   :  { %2495 = vst.msk [vmem:[#allocation13] sm:$0xf] %vm2494_vm3, %v2772_v25 }
 0x316   :  { %3006 = vmatmul.mubr.msk.f32.gmra.mrb[150].mxu0 %vm1660_vm14, %v1609_v51 }
 0x317   :  { %v1613_v28 = vpop.f32.mrb[144].mxu1 }
 0x318   :  { %v1614_v24 = vadd.f32 %v3768_v22, %v1613_v28  ;;  %v1615_v32 = vpop.f32.mrb[145].mxu1 }
 0x319   :  { %v2929_v35 = vpop.f32.mrb[98].mxu0 }
 0x31a   :  { %v2775_v37 = vpack.c.bf16 %v2929_v35, %v2929_v35  ;;  %v1929_v61 = vpop.f32.mrb[99].mxu0  ;;  %3008 = vmatprep.mubr.msk.f32.mxu0 %vm1660_vm14, %v1614_v24 }
 0x31b   :  { %v2774_v20 = vpack.c.bf16 %v1929_v61, %v1929_v61  ;;  %v1618_v10 = vpop.f32.mrb[146].mxu1 }
 0x31c   :  { %2498 = vst.msk [vmem:[#allocation13 + $0xc] sm:$0xf] %vm2494_vm3, %v2775_v37  ;;  %v1619_v38 = vadd.f32 %v3768_v22, %v1618_v10  ;;  %v1620_v41 = vpop.f32.mrb[147].mxu1 }
 0x31d   :  { %2497 = vst.msk [vmem:[#allocation13 + $0x8] sm:$0xf] %vm2494_vm3, %v2774_v20 }
 0x31e   :  { %3009 = vmatmul.mubr.msk.f32.gmra.mrb[152].mxu0 %vm1660_vm14, %v1619_v38 }
 0x31f   :  { %v1623_v42 = vpop.f32.mrb[148].mxu1 }
 0x320   :  { %v1624_v40 = vadd.f32 %v3768_v22, %v1623_v42  ;;  %v1625_v45 = vpop.f32.mrb[149].mxu1 }
 0x321   :  { %v2932_v7 = vpop.f32.mrb[100].mxu0 }
 0x322   :  { %v2777_v47 = vpack.c.bf16 %v2932_v7, %v2932_v7  ;;  %v1939_v36 = vpop.f32.mrb[101].mxu0  ;;  %3011 = vmatprep.mubr.msk.f32.mxu0 %vm1660_vm14, %v1624_v40 }
 0x323   :  { %v2776_v49 = vpack.c.bf16 %v1939_v36, %v1939_v36  ;;  %v1628_v17 = vpop.f32.mrb[150].mxu1 }
 0x324   :  { %2500 = vst.msk [vmem:[#allocation13 + $0x14] sm:$0xf] %vm2494_vm3, %v2777_v47  ;;  %v1629_v50 = vadd.f32 %v3768_v22, %v1628_v17  ;;  %v1630_v19 = vpop.f32.mrb[151].mxu1 }
 0x325   :  { %2499 = vst.msk [vmem:[#allocation13 + $0x10] sm:$0xf] %vm2494_vm3, %v2776_v49 }
 0x326   :  { %3012 = vmatmul.mubr.msk.f32.gmra.mrb[154].mxu0 %vm1660_vm14, %v1629_v50 }
 0x327   :  { %v1633_v59 = vpop.f32.mrb[152].mxu1 }
 0x328   :  { %v1634_v53 = vadd.f32 %v3768_v22, %v1633_v59  ;;  %v1635_v0 = vpop.f32.mrb[153].mxu1 }
 0x329   :  { %v2935_v55 = vpop.f32.mrb[102].mxu0 }
 0x32a   :  { %v2779_v52 = vpack.c.bf16 %v2935_v55, %v2935_v55  ;;  %v1949_v56 = vpop.f32.mrb[103].mxu0  ;;  %3014 = vmatprep.mubr.msk.f32.mxu0 %vm1660_vm14, %v1634_v53 }
 0x32b   :  { %v2778_v58 = vpack.c.bf16 %v1949_v56, %v1949_v56  ;;  %v1638_v13 = vpop.f32.mrb[154].mxu1 }
 0x32c   :  { %2502 = vst.msk [vmem:[#allocation13 + $0x1c] sm:$0xf] %vm2494_vm3, %v2779_v52  ;;  %v1639_v33 = vadd.f32 %v3768_v22, %v1638_v13  ;;  %v1640_v62 = vpop.f32.mrb[155].mxu1 }
 0x32d   :  { %2501 = vst.msk [vmem:[#allocation13 + $0x18] sm:$0xf] %vm2494_vm3, %v2778_v58 }
 0x32e   :  { %3015 = vmatmul.mubr.msk.f32.gmra.mrb[156].mxu0 %vm1660_vm14, %v1639_v33 }
 0x32f   :  { %v1643_v14 = vpop.f32.mrb[156].mxu1 }
 0x330   :  { %v1644_v63 = vadd.f32 %v3768_v22, %v1643_v14  ;;  %v1645_v2 = vpop.f32.mrb[157].mxu1 }
 0x331   :  { %v2938_v8 = vpop.f32.mrb[104].mxu0 }
 0x332   :  { %v2781_v48 = vpack.c.bf16 %v2938_v8, %v2938_v8  ;;  %v1959_v31 = vpop.f32.mrb[105].mxu0  ;;  %3017 = vmatprep.mubr.msk.f32.mxu0 %vm1660_vm14, %v1644_v63 }
 0x333   :  { %v2780_v46 = vpack.c.bf16 %v1959_v31, %v1959_v31  ;;  %v1648_v3 = vpop.f32.mrb[158].mxu1 }
 0x334   :  { %2504 = vst.msk [vmem:[#allocation13 + $0x24] sm:$0xf] %vm2494_vm3, %v2781_v48  ;;  %v1649_v30 = vadd.f32 %v3768_v22, %v1648_v3  ;;  %v1650_v34 = vpop.f32.mrb[159].mxu1 }
 0x335   :  { %2503 = vst.msk [vmem:[#allocation13 + $0x20] sm:$0xf] %vm2494_vm3, %v2780_v46 }
 0x336   :  { %3018 = vmatmul.mubr.msk.f32.gmra.mrb[158].mxu0 %vm1660_vm14, %v1649_v30 }
 0x339   :  { %v2941_v44 = vpop.f32.mrb[106].mxu0 }
 0x33a   :  { %v2783_v4 = vpack.c.bf16 %v2941_v44, %v2941_v44  ;;  %v1969_v26 = vpop.f32.mrb[107].mxu0 }
 0x33b   :  { %v2782_v6 = vpack.c.bf16 %v1969_v26, %v1969_v26 }
 0x33c   :  { %2506 = vst.msk [vmem:[#allocation13 + $0x2c] sm:$0xf] %vm2494_vm3, %v2783_v4 }
 0x33d   :  { %2505 = vst.msk [vmem:[#allocation13 + $0x28] sm:$0xf] %vm2494_vm3, %v2782_v6 }
 0x341   :  { %v2944_v43 = vpop.f32.mrb[108].mxu0 }
 0x342   :  { %v2785_v29 = vpack.c.bf16 %v2944_v43, %v2944_v43  ;;  %v1979_v27 = vpop.f32.mrb[109].mxu0 }
 0x343   :  { %v2784_v60 = vpack.c.bf16 %v1979_v27, %v1979_v27 }
 0x344   :  { %2508 = vst.msk [vmem:[#allocation13 + $0x34] sm:$0xf] %vm2494_vm3, %v2785_v29 }
 0x345   :  { %2507 = vst.msk [vmem:[#allocation13 + $0x30] sm:$0xf] %vm2494_vm3, %v2784_v60 }
 0x349   :  { %v2947_v22 = vpop.f32.mrb[110].mxu0 }
 0x34a   :  { %v2787_v11 = vpack.c.bf16 %v2947_v22, %v2947_v22  ;;  %v1989_v12 = vpop.f32.mrb[111].mxu0 }
 0x34b   :  { %v2786_v15 = vpack.c.bf16 %v1989_v12, %v1989_v12 }
 0x34c   :  { %2510 = vst.msk [vmem:[#allocation13 + $0x3c] sm:$0xf] %vm2494_vm3, %v2787_v11 }
 0x34d   :  { %2509 = vst.msk [vmem:[#allocation13 + $0x38] sm:$0xf] %vm2494_vm3, %v2786_v15 }
 0x351   :  { %v2950_v57 = vpop.f32.mrb[112].mxu0 }
 0x352   :  { %v2789_v16 = vpack.c.bf16 %v2950_v57, %v2950_v57  ;;  %v1999_v9 = vpop.f32.mrb[113].mxu0 }
 0x353   :  { %v2788_v39 = vpack.c.bf16 %v1999_v9, %v1999_v9 }
 0x354   :  { %2512 = vst.msk [vmem:[#allocation13 + $0x44] sm:$0xf] %vm2494_vm3, %v2789_v16 }
 0x355   :  { %2511 = vst.msk [vmem:[#allocation13 + $0x40] sm:$0xf] %vm2494_vm3, %v2788_v39 }
 0x359   :  { %v2953_v54 = vpop.f32.mrb[114].mxu0 }
 0x35a   :  { %v2791_v18 = vpack.c.bf16 %v2953_v54, %v2953_v54  ;;  %v2009_v21 = vpop.f32.mrb[115].mxu0 }
 0x35b   :  { %v2790_v23 = vpack.c.bf16 %v2009_v21, %v2009_v21 }
 0x35c   :  { %2514 = vst.msk [vmem:[#allocation13 + $0x4c] sm:$0xf] %vm2494_vm3, %v2791_v18 }
 0x35d   :  { %2513 = vst.msk [vmem:[#allocation13 + $0x48] sm:$0xf] %vm2494_vm3, %v2790_v23 }
 0x361   :  { %v2956_v25 = vpop.f32.mrb[116].mxu0 }
 0x362   :  { %v2793_v5 = vpack.c.bf16 %v2956_v25, %v2956_v25  ;;  %v2019_v51 = vpop.f32.mrb[117].mxu0 }
 0x363   :  { %v2792_v1 = vpack.c.bf16 %v2019_v51, %v2019_v51 }
 0x364   :  { %2516 = vst.msk [vmem:[#allocation13 + $0x54] sm:$0xf] %vm2494_vm3, %v2793_v5 }
 0x365   :  { %2515 = vst.msk [vmem:[#allocation13 + $0x50] sm:$0xf] %vm2494_vm3, %v2792_v1 }
 0x369   :  { %v2959_v28 = vpop.f32.mrb[118].mxu0 }
 0x36a   :  { %v2795_v24 = vpack.c.bf16 %v2959_v28, %v2959_v28  ;;  %v2029_v32 = vpop.f32.mrb[119].mxu0 }
 0x36b   :  { %v2794_v35 = vpack.c.bf16 %v2029_v32, %v2029_v32 }
 0x36c   :  { %2518 = vst.msk [vmem:[#allocation13 + $0x5c] sm:$0xf] %vm2494_vm3, %v2795_v24 }
 0x36d   :  { %2517 = vst.msk [vmem:[#allocation13 + $0x58] sm:$0xf] %vm2494_vm3, %v2794_v35 }
 0x371   :  { %v2962_v37 = vpop.f32.mrb[120].mxu0 }
 0x372   :  { %v2797_v61 = vpack.c.bf16 %v2962_v37, %v2962_v37  ;;  %v2039_v20 = vpop.f32.mrb[121].mxu0 }
 0x373   :  { %v2796_v10 = vpack.c.bf16 %v2039_v20, %v2039_v20 }
 0x374   :  { %2520 = vst.msk [vmem:[#allocation13 + $0x64] sm:$0xf] %vm2494_vm3, %v2797_v61 }
 0x375   :  { %2519 = vst.msk [vmem:[#allocation13 + $0x60] sm:$0xf] %vm2494_vm3, %v2796_v10 }
 0x379   :  { %v2965_v38 = vpop.f32.mrb[122].mxu0 }
 0x37a   :  { %v2799_v41 = vpack.c.bf16 %v2965_v38, %v2965_v38  ;;  %v2049_v42 = vpop.f32.mrb[123].mxu0 }
 0x37b   :  { %v2798_v40 = vpack.c.bf16 %v2049_v42, %v2049_v42 }
 0x37c   :  { %2522 = vst.msk [vmem:[#allocation13 + $0x6c] sm:$0xf] %vm2494_vm3, %v2799_v41 }
 0x37d   :  { %2521 = vst.msk [vmem:[#allocation13 + $0x68] sm:$0xf] %vm2494_vm3, %v2798_v40 }
 0x381   :  { %v2968_v45 = vpop.f32.mrb[124].mxu0 }
 0x382   :  { %v2801_v7 = vpack.c.bf16 %v2968_v45, %v2968_v45  ;;  %v2059_v47 = vpop.f32.mrb[125].mxu0 }
 0x383   :  { %v2800_v36 = vpack.c.bf16 %v2059_v47, %v2059_v47 }
 0x384   :  { %2524 = vst.msk [vmem:[#allocation13 + $0x74] sm:$0xf] %vm2494_vm3, %v2801_v7 }
 0x385   :  { %2523 = vst.msk [vmem:[#allocation13 + $0x70] sm:$0xf] %vm2494_vm3, %v2800_v36 }
 0x389   :  { %v2971_v49 = vpop.f32.mrb[126].mxu0 }
 0x38a   :  { %v2803_v17 = vpack.c.bf16 %v2971_v49, %v2971_v49  ;;  %v2069_v50 = vpop.f32.mrb[127].mxu0 }
 0x38b   :  { %v2802_v19 = vpack.c.bf16 %v2069_v50, %v2069_v50 }
 0x38c   :  { %2526 = vst.msk [vmem:[#allocation13 + $0x7c] sm:$0xf] %vm2494_vm3, %v2803_v17 }
 0x38d   :  { %2525 = vst.msk [vmem:[#allocation13 + $0x78] sm:$0xf] %vm2494_vm3, %v2802_v19 }
 0x391   :  { %v2974_v59 = vpop.f32.mrb[128].mxu0 }
 0x392   :  { %v2805_v53 = vpack.c.bf16 %v2974_v59, %v2974_v59  ;;  %v2079_v0 = vpop.f32.mrb[129].mxu0 }
 0x393   :  { %v2804_v55 = vpack.c.bf16 %v2079_v0, %v2079_v0 }
 0x394   :  { %2528 = vst.msk [vmem:[#allocation13 + $0x84] sm:$0xf] %vm2494_vm3, %v2805_v53 }
 0x395   :  { %2527 = vst.msk [vmem:[#allocation13 + $0x80] sm:$0xf] %vm2494_vm3, %v2804_v55 }
 0x399   :  { %v2977_v52 = vpop.f32.mrb[130].mxu0 }
 0x39a   :  { %v2807_v56 = vpack.c.bf16 %v2977_v52, %v2977_v52  ;;  %v2089_v58 = vpop.f32.mrb[131].mxu0 }
 0x39b   :  { %v2806_v13 = vpack.c.bf16 %v2089_v58, %v2089_v58 }
 0x39c   :  { %2530 = vst.msk [vmem:[#allocation13 + $0x8c] sm:$0xf] %vm2494_vm3, %v2807_v56 }
 0x39d   :  { %2529 = vst.msk [vmem:[#allocation13 + $0x88] sm:$0xf] %vm2494_vm3, %v2806_v13 }
 0x3a1   :  { %v2980_v33 = vpop.f32.mrb[132].mxu0 }
 0x3a2   :  { %v2809_v62 = vpack.c.bf16 %v2980_v33, %v2980_v33  ;;  %v2099_v14 = vpop.f32.mrb[133].mxu0 }
 0x3a3   :  { %v2808_v63 = vpack.c.bf16 %v2099_v14, %v2099_v14 }
 0x3a4   :  { %2532 = vst.msk [vmem:[#allocation13 + $0x94] sm:$0xf] %vm2494_vm3, %v2809_v62 }
 0x3a5   :  { %2531 = vst.msk [vmem:[#allocation13 + $0x90] sm:$0xf] %vm2494_vm3, %v2808_v63 }
 0x3a9   :  { %v2983_v2 = vpop.f32.mrb[134].mxu0 }
 0x3aa   :  { %v2811_v8 = vpack.c.bf16 %v2983_v2, %v2983_v2  ;;  %v2109_v48 = vpop.f32.mrb[135].mxu0 }
 0x3ab   :  { %v2810_v31 = vpack.c.bf16 %v2109_v48, %v2109_v48 }
 0x3ac   :  { %2534 = vst.msk [vmem:[#allocation13 + $0x9c] sm:$0xf] %vm2494_vm3, %v2811_v8 }
 0x3ad   :  { %2533 = vst.msk [vmem:[#allocation13 + $0x98] sm:$0xf] %vm2494_vm3, %v2810_v31 }
 0x3b1   :  { %v2986_v46 = vpop.f32.mrb[136].mxu0 }
 0x3b2   :  { %v2813_v3 = vpack.c.bf16 %v2986_v46, %v2986_v46  ;;  %v2119_v30 = vpop.f32.mrb[137].mxu0 }
 0x3b3   :  { %v2812_v34 = vpack.c.bf16 %v2119_v30, %v2119_v30 }
 0x3b4   :  { %2536 = vst.msk [vmem:[#allocation13 + $0xa4] sm:$0xf] %vm2494_vm3, %v2813_v3 }
 0x3b5   :  { %2535 = vst.msk [vmem:[#allocation13 + $0xa0] sm:$0xf] %vm2494_vm3, %v2812_v34 }
 0x3b9   :  { %v2989_v44 = vpop.f32.mrb[138].mxu0 }
 0x3ba   :  { %v2815_v4 = vpack.c.bf16 %v2989_v44, %v2989_v44  ;;  %v2129_v26 = vpop.f32.mrb[139].mxu0 }
 0x3bb   :  { %v2814_v6 = vpack.c.bf16 %v2129_v26, %v2129_v26 }
 0x3bc   :  { %2538 = vst.msk [vmem:[#allocation13 + $0xac] sm:$0xf] %vm2494_vm3, %v2815_v4 }
 0x3bd   :  { %2537 = vst.msk [vmem:[#allocation13 + $0xa8] sm:$0xf] %vm2494_vm3, %v2814_v6 }
 0x3c1   :  { %v2992_v43 = vpop.f32.mrb[140].mxu0 }
 0x3c2   :  { %v2817_v29 = vpack.c.bf16 %v2992_v43, %v2992_v43  ;;  %v2139_v27 = vpop.f32.mrb[141].mxu0 }
 0x3c3   :  { %v2816_v60 = vpack.c.bf16 %v2139_v27, %v2139_v27 }
 0x3c4   :  { %2540 = vst.msk [vmem:[#allocation13 + $0xb4] sm:$0xf] %vm2494_vm3, %v2817_v29 }
 0x3c5   :  { %2539 = vst.msk [vmem:[#allocation13 + $0xb0] sm:$0xf] %vm2494_vm3, %v2816_v60 }
 0x3c9   :  { %v2995_v22 = vpop.f32.mrb[142].mxu0 }
 0x3ca   :  { %v2819_v11 = vpack.c.bf16 %v2995_v22, %v2995_v22  ;;  %v2149_v12 = vpop.f32.mrb[143].mxu0 }
 0x3cb   :  { %v2818_v15 = vpack.c.bf16 %v2149_v12, %v2149_v12 }
 0x3cc   :  { %2542 = vst.msk [vmem:[#allocation13 + $0xbc] sm:$0xf] %vm2494_vm3, %v2819_v11 }
 0x3cd   :  { %2541 = vst.msk [vmem:[#allocation13 + $0xb8] sm:$0xf] %vm2494_vm3, %v2818_v15 }
 0x3d1   :  { %v2998_v57 = vpop.f32.mrb[144].mxu0 }
 0x3d2   :  { %v2821_v16 = vpack.c.bf16 %v2998_v57, %v2998_v57  ;;  %v2159_v9 = vpop.f32.mrb[145].mxu0 }
 0x3d3   :  { %v2820_v39 = vpack.c.bf16 %v2159_v9, %v2159_v9 }
 0x3d4   :  { %2544 = vst.msk [vmem:[#allocation13 + $0xc4] sm:$0xf] %vm2494_vm3, %v2821_v16 }
 0x3d5   :  { %2543 = vst.msk [vmem:[#allocation13 + $0xc0] sm:$0xf] %vm2494_vm3, %v2820_v39 }
 0x3d9   :  { %v3001_v54 = vpop.f32.mrb[146].mxu0 }
 0x3da   :  { %v2823_v18 = vpack.c.bf16 %v3001_v54, %v3001_v54  ;;  %v2169_v21 = vpop.f32.mrb[147].mxu0 }
 0x3db   :  { %v2822_v23 = vpack.c.bf16 %v2169_v21, %v2169_v21 }
 0x3dc   :  { %2546 = vst.msk [vmem:[#allocation13 + $0xcc] sm:$0xf] %vm2494_vm3, %v2823_v18 }
 0x3dd   :  { %2545 = vst.msk [vmem:[#allocation13 + $0xc8] sm:$0xf] %vm2494_vm3, %v2822_v23 }
 0x3e1   :  { %v3004_v25 = vpop.f32.mrb[148].mxu0 }
 0x3e2   :  { %v2825_v5 = vpack.c.bf16 %v3004_v25, %v3004_v25  ;;  %v2179_v51 = vpop.f32.mrb[149].mxu0 }
 0x3e3   :  { %v2824_v1 = vpack.c.bf16 %v2179_v51, %v2179_v51 }
 0x3e4   :  { %2548 = vst.msk [vmem:[#allocation13 + $0xd4] sm:$0xf] %vm2494_vm3, %v2825_v5 }
 0x3e5   :  { %2547 = vst.msk [vmem:[#allocation13 + $0xd0] sm:$0xf] %vm2494_vm3, %v2824_v1 }
 0x3e9   :  { %v3007_v28 = vpop.f32.mrb[150].mxu0 }
 0x3ea   :  { %v2827_v24 = vpack.c.bf16 %v3007_v28, %v3007_v28  ;;  %v2189_v32 = vpop.f32.mrb[151].mxu0 }
 0x3eb   :  { %v2826_v35 = vpack.c.bf16 %v2189_v32, %v2189_v32 }
 0x3ec   :  { %2550 = vst.msk [vmem:[#allocation13 + $0xdc] sm:$0xf] %vm2494_vm3, %v2827_v24 }
 0x3ed   :  { %2549 = vst.msk [vmem:[#allocation13 + $0xd8] sm:$0xf] %vm2494_vm3, %v2826_v35 }
 0x3f1   :  { %v3010_v37 = vpop.f32.mrb[152].mxu0 }
 0x3f2   :  { %v2829_v61 = vpack.c.bf16 %v3010_v37, %v3010_v37  ;;  %v2199_v20 = vpop.f32.mrb[153].mxu0 }
 0x3f3   :  { %v2828_v10 = vpack.c.bf16 %v2199_v20, %v2199_v20 }
 0x3f4   :  { %2552 = vst.msk [vmem:[#allocation13 + $0xe4] sm:$0xf] %vm2494_vm3, %v2829_v61 }
 0x3f5   :  { %2551 = vst.msk [vmem:[#allocation13 + $0xe0] sm:$0xf] %vm2494_vm3, %v2828_v10 }
 0x3f9   :  { %v3013_v38 = vpop.f32.mrb[154].mxu0 }
 0x3fa   :  { %v2831_v41 = vpack.c.bf16 %v3013_v38, %v3013_v38  ;;  %v2209_v42 = vpop.f32.mrb[155].mxu0 }
 0x3fb   :  { %v2830_v40 = vpack.c.bf16 %v2209_v42, %v2209_v42 }
 0x3fc   :  { %2554 = vst.msk [vmem:[#allocation13 + $0xec] sm:$0xf] %vm2494_vm3, %v2831_v41 }
 0x3fd   :  { %2553 = vst.msk [vmem:[#allocation13 + $0xe8] sm:$0xf] %vm2494_vm3, %v2830_v40 }
 0x401   :  { %v3016_v45 = vpop.f32.mrb[156].mxu0 }
 0x402   :  { %v2833_v7 = vpack.c.bf16 %v3016_v45, %v3016_v45  ;;  %v2219_v47 = vpop.f32.mrb[157].mxu0 }
 0x403   :  { %v2832_v36 = vpack.c.bf16 %v2219_v47, %v2219_v47 }
 0x404   :  { %2556 = vst.msk [vmem:[#allocation13 + $0xf4] sm:$0xf] %vm2494_vm3, %v2833_v7 }
 0x405   :  { %2555 = vst.msk [vmem:[#allocation13 + $0xf0] sm:$0xf] %vm2494_vm3, %v2832_v36 }
 0x409   :  { %v3019_v49 = vpop.f32.mrb[158].mxu0 }
 0x40a   :  { %v2835_v17 = vpack.c.bf16 %v3019_v49, %v3019_v49  ;;  %v2229_v50 = vpop.f32.mrb[159].mxu0 }
 0x40b   :  { %v2834_v19 = vpack.c.bf16 %v2229_v50, %v2229_v50 }
 0x40c   :  { %2558 = vst.msk [vmem:[#allocation13 + $0xfc] sm:$0xf] %vm2494_vm3, %v2835_v17 }
 0x40d   :  { %2557 = vst.msk [vmem:[#allocation13 + $0xf8] sm:$0xf] %vm2494_vm3, %v2834_v19 }
 0x40e   :  { %3278 = shalt.err (!%p3275_p10)
}
 0x40f   :  { %s3279_s14 = scalar_lea.hbm %s4014_s6, 4096 }
 0x410   :  { %p3280_p11 = scmp.ne.s32.totalorder %s4014_s6, %s3279_s14  ;;  %p3283_p12 = scmp.lt.u32.totalorder %s3279_s14, %s4014_s6 }
 0x412   :  { %p3285_p13 = pnand %p3283_p12, %p3280_p11 }
 0x414   :  { %3288 = shalt.err (!%p3285_p13)
}
 0x415   :  { %s3312_s28 = smov 64   ;;  %s3313_s29 = smov 4  }
 0x416   :  { %2570 = dma.vmem_to_hbm [thread:$0]  %s2565_s22, 4096, %s4014_s6, [#allocation4], %s3312_s28, %s3312_s28, %s3313_s29  }
 0x417   :  { %3297 = dma.done.wait [#allocation4], 4096  }
 0x418   :  { %3298 = vsyncadd [#allocation4], 4294963200 }
 0x419   :  { %2574 = vsyncpa [#allocation3], 1 }
 0x41a   :  { %2575 = vsyncpa [#allocation6], 1 }
 0x41b   :  { %2576 = vsyncpa [#allocation9], 1 }
 0x41c   :  { %2577 = vsyncpa [#allocation12], 1 }
 0x41d   :  { %2578 = vsyncpa [#allocation4], 1 }

</bundles_post_ra>
